<compile_context>
chip_gen: v6e
topology: v6e:2x2x1
jax: 0.10.0
libtpu: 0.0.40
codegen_flags: <defaults>
</compile_context>

<pallas_src>
import functools
import math

import numpy as np
import jax
import jax.numpy as jnp
from jax import lax
from jax.experimental import pallas as pl
from jax.experimental.pallas import tpu as pltpu


_VMEM_BUDGET = 48 * 1024 * 1024   # conservative vs v7x's 64 MiB physical VMEM


def _round_up(x, m):
    return ((x + m - 1) // m) * m


def _check_vmem(bytes_per_step, where):
    est = 2 * bytes_per_step      # double-buffered input/output pipeline
    if est > _VMEM_BUDGET:
        raise ValueError(
            f"{where}: estimated VMEM {est} bytes exceeds budget {_VMEM_BUDGET}")


def _pick_tile(dim, preferred):
    for t in preferred:
        if dim % t == 0:
            return t
    if dim <= 1024:               # full-extent block, guarded by _check_vmem
        return dim
    for t in (64, 32, 16, 8):
        if dim % t == 0:
            return t
    return dim


# ----------------------------------------------------------------------------
# Tiled projection matmuls (bf16 operands, f32 accumulation on the MXU)
# ----------------------------------------------------------------------------
def _matmul_kernel_single(x_ref, w_ref, o_ref):
    # K fits one block: no scratch, no init/finalize phases.
    o_ref[...] = jnp.dot(x_ref[...], w_ref[...],
                         preferred_element_type=jnp.float32).astype(o_ref.dtype)


def _matmul_kernel_multi(x_ref, w_ref, o_ref, acc_ref):
    k = pl.program_id(2)

    @pl.when(k == 0)
    def _():
        acc_ref[...] = jnp.zeros_like(acc_ref)

    acc_ref[...] += jnp.dot(x_ref[...], w_ref[...],
                            preferred_element_type=jnp.float32)

    @pl.when(k == pl.num_programs(2) - 1)
    def _():
        o_ref[...] = acc_ref[...].astype(o_ref.dtype)


def _matmul(x, w, out_dtype):
    """x [M, K] @ w [K, N] -> [M, N]."""
    M, K = x.shape
    K2, N = w.shape
    assert K == K2
    tm = _pick_tile(M, (512, 256, 128, 64))
    tn = _pick_tile(N, (512, 256, 128))
    tk = _pick_tile(K, (512, 256, 128))
    bpe = x.dtype.itemsize
    step_bytes = (tm * tk + tk * tn) * bpe + tm * tn * (jnp.dtype(out_dtype).itemsize + 4)
    _check_vmem(step_bytes, "_matmul")

    if K // tk == 1:
        return pl.pallas_call(
            _matmul_kernel_single,
            out_shape=jax.ShapeDtypeStruct((M, N), out_dtype),
            grid=(M // tm, N // tn),
            in_specs=[pl.BlockSpec((tm, K), lambda i, j: (i, 0)),
                      pl.BlockSpec((K, tn), lambda i, j: (0, j))],
            out_specs=pl.BlockSpec((tm, tn), lambda i, j: (i, j)),
            compiler_params=pltpu.CompilerParams(
                dimension_semantics=("parallel", "parallel")),
        )(x, w)

    return pl.pallas_call(
        _matmul_kernel_multi,
        out_shape=jax.ShapeDtypeStruct((M, N), out_dtype),
        grid=(M // tm, N // tn, K // tk),
        in_specs=[pl.BlockSpec((tm, tk), lambda i, j, k: (i, k)),
                  pl.BlockSpec((tk, tn), lambda i, j, k: (k, j))],
        out_specs=pl.BlockSpec((tm, tn), lambda i, j, k: (i, j)),
        scratch_shapes=[pltpu.VMEM((tm, tn), jnp.float32)],
        compiler_params=pltpu.CompilerParams(
            dimension_semantics=("parallel", "parallel", "arbitrary")),
    )(x, w)


# ----------------------------------------------------------------------------
# Banded (local-window) multi-head attention: one KV slab per query block
# ----------------------------------------------------------------------------
def _local_attn_kernel(q_ref, k_ref, v_ref, *rest,
                       n_heads, d_k, t_q, t_kv, half_w, seq_len, kv_cap,
                       has_mask):
    if has_mask:
        mb_ref, o_ref = rest
    else:
        (o_ref,) = rest
        mb_ref = None

    qi = pl.program_id(1)
    q_start = qi * t_q
    # Absolute start of the window-aligned KV slab this block was given
    # (must match the wrapper's np.clip formula exactly).
    kv_start = jnp.clip(q_start - half_w, 0, kv_cap)

    # Band mask + key-padding mask computed in-kernel; combined with the user
    # bias slab into ONE additive f32 bias tile, hoisted out of the head loop.
    rows = q_start + lax.broadcasted_iota(jnp.int32, (t_q, t_kv), 0)
    cols = kv_start + lax.broadcasted_iota(jnp.int32, (t_q, t_kv), 1)
    invalid = jnp.logical_or(jnp.abs(rows - cols) > half_w, cols >= seq_len)
    user_bias = mb_ref[0, 0] if has_mask else jnp.float32(0.0)
    # Finite sentinel (not -inf): fully-masked rows give a finite uniform
    # average instead of NaN (benign semantic divergence from torch's -inf).
    bias = jnp.where(invalid, jnp.float32(-1e30), user_bias)

    out_heads = []
    for h in range(n_heads):
        hs = slice(h * d_k, (h + 1) * d_k)
        q_h = q_ref[0, :, hs]          # (t_q, d_k)  bf16 (1/sqrt(d_k) folded)
        k_h = k_ref[0, 0, :, hs]       # (t_kv, d_k) bf16
        v_h = v_ref[0, 0, :, hs]       # (t_kv, d_k) bf16
        # Contract last-vs-last: MXU-native transposed-RHS path, no transpose.
        s = lax.dot_general(q_h, k_h, (((1,), (1,)), ((), ())),
                            preferred_element_type=jnp.float32)
        s = s + bias
        m = jnp.max(s, axis=-1, keepdims=True)
        p = jnp.exp(s - m)
        l = jnp.sum(p, axis=-1, keepdims=True)
        inv_l = pl.reciprocal(l, approx=True)               # EUP slot
        o_h = jnp.dot(p.astype(v_h.dtype), v_h,
                      preferred_element_type=jnp.float32)
        out_heads.append((o_h * inv_l).astype(o_ref.dtype))
    # One lane-dense (t_q, D) store instead of n_heads masked d_k-lane stores.
    o_ref[0] = jnp.concatenate(out_heads, axis=-1)


# ----------------------------------------------------------------------------
# LocalAttention forward (matches the PyTorch module semantics)
# ----------------------------------------------------------------------------
def local_attention_forward(x, mask, params, n_heads, window_size, *,
                            compute_dtype=jnp.bfloat16):
    """
    x:    [B, S, D] float32
    mask: [B, S, S] bool/int (nonzero/True = masked out), or None
    params: dict with 'W_q','W_k','W_v','W_o' each [D, D] (y = x @ W)
    """
    B, S, D = x.shape
    assert D % n_heads == 0
    d_k = D // n_heads
    half_w = window_size // 2
    inv_scale = 1.0 / math.sqrt(d_k)

    # --- tiles sized to the window: the whole window of a query block fits in
    # one lane-dense t_kv-wide KV slab.
    t_q = 128 - 2 * half_w
    if t_q < 64:                       # very wide windows: 128-row Q blocks
        t_q = 128
    t_q = max(8, (min(t_q, _round_up(S, 8)) // 8) * 8)
    t_kv = _round_up(t_q + 2 * half_w, 128)
    # TODO(synk): for windows so wide that the slab no longer fits VMEM, fall
    # back to a multi-slab online-softmax variant (not needed for small windows).
    n_q = -(-S // t_q)
    s_q = n_q * t_q
    s_kv = max(s_q, t_kv)

    # --- fused QKV projection; the score scale is folded into W_q (free).
    w_qkv = jnp.concatenate(
        [params["W_q"] * inv_scale, params["W_k"], params["W_v"]],
        axis=1).astype(compute_dtype)                        # [D, 3D]
    x_pad = jnp.pad(x, ((0, 0), (0, s_q - S), (0, 0))).astype(compute_dtype)
    qkv = _matmul(x_pad.reshape(B * s_q, D), w_qkv, out_dtype=compute_dtype)
    qkv = qkv.reshape(B, s_q, 3 * D)
    q = qkv[..., :D]
    k = qkv[..., D:2 * D]
    v = qkv[..., 2 * D:]
    if s_kv > s_q:
        pad = ((0, 0), (0, s_kv - s_q), (0, 0))
        k = jnp.pad(k, pad)
        v = jnp.pad(v, pad)

    # --- window-aligned KV slabs: K_slab[b, qi] = K[b, kv_start(qi):+t_kv]
    kv_starts = np.clip(np.arange(n_q) * t_q - half_w, 0, s_kv - t_kv)
    col_idx = kv_starts[:, None] + np.arange(t_kv)[None, :]   # (n_q, t_kv)
    k_slab = k[:, col_idx, :]                                  # (B, n_q, t_kv, D)
    v_slab = v[:, col_idx, :]

    has_mask = mask is not None
    ins = [q, k_slab, v_slab]
    in_specs = [
        pl.BlockSpec((1, t_q, D), lambda b, qi: (b, qi, 0)),
        pl.BlockSpec((1, 1, t_kv, D), lambda b, qi: (b, qi, 0, 0)),
        pl.BlockSpec((1, 1, t_kv, D), lambda b, qi: (b, qi, 0, 0)),
    ]
    mask_bytes = 0
    if has_mask:
        # Gather the user mask into per-block additive-bias slabs (f32, tiny).
        mask_pad = jnp.pad(mask.astype(jnp.bool_),
                           ((0, 0), (0, s_q - S), (0, s_kv - S)))
        bias_full = jnp.where(mask_pad, jnp.float32(-1e30), jnp.float32(0.0))
        row_idx = np.arange(n_q)[:, None] * t_q + np.arange(t_q)[None, :]
        mask_slab = bias_full[:, row_idx[:, :, None], col_idx[:, None, :]]
        ins.append(mask_slab)                                  # (B, n_q, t_q, t_kv)
        in_specs.append(pl.BlockSpec((1, 1, t_q, t_kv),
                                     lambda b, qi: (b, qi, 0, 0)))
        mask_bytes = t_q * t_kv * 4

    step_bytes = (2 * t_q * D + 2 * t_kv * D) * 2 + mask_bytes
    _check_vmem(step_bytes, "local_attention")

    kernel = functools.partial(
        _local_attn_kernel, n_heads=n_heads, d_k=d_k, t_q=t_q, t_kv=t_kv,
        half_w=half_w, seq_len=S, kv_cap=s_kv - t_kv, has_mask=has_mask)

    attn = pl.pallas_call(
        kernel,
        out_shape=jax.ShapeDtypeStruct((B, s_q, D), compute_dtype),
        grid=(B, n_q),
        in_specs=in_specs,
        out_specs=pl.BlockSpec((1, t_q, D), lambda b, qi: (b, qi, 0)),
        compiler_params=pltpu.CompilerParams(
            dimension_semantics=("parallel", "parallel")),
    )(*ins)

    out = _matmul(attn.reshape(B * s_q, D),
                  params["W_o"].astype(compute_dtype),
                  out_dtype=x.dtype)
    return out.reshape(B, s_q, D)[:, :S, :]


# Pure-JAX f32 reference replicating the PyTorch module exactly.
def _reference(x, mask, params, n_heads, window_size):
    B, S, D = x.shape
    d_k = D // n_heads
    scale = math.sqrt(d_k)

    def split(y):
        return y.reshape(B, S, n_heads, d_k).transpose(0, 2, 1, 3)

    q = split(x @ params["W_q"])
    k = split(x @ params["W_k"])
    v = split(x @ params["W_v"])
    idx = jnp.arange(S)
    local = jnp.abs(idx[:, None] - idx[None, :]) > (window_size // 2)
    if mask is None:
        cm = jnp.broadcast_to(local, (B, S, S))
    else:
        cm = jnp.logical_or(mask, local[None])
    cm = cm[:, None, :, :]
    scores = jnp.einsum("bhqd,bhkd->bhqk", q, k) / scale
    scores = jnp.where(cm, -jnp.inf, scores)
    w = jax.nn.softmax(scores, axis=-1)
    out = jnp.einsum("bhqk,bhkd->bhqd", w, v)
    out = out.transpose(0, 2, 1, 3).reshape(B, S, D)
    return out @ params["W_o"]


if __name__ == "__main__":
    # Shapes from the module spec: B=2, S=100, d_model=512, 8 heads, window 16.
    batch_size = 2
    seq_len = 100
    d_model = 512
    n_heads = 8
    window_size = 16

    key = jax.random.PRNGKey(0)
    kx, kq, kk, kv, ko = jax.random.split(key, 5)

    x = jax.random.normal(kx, (batch_size, seq_len, d_model), dtype=jnp.float32)
    mask = jnp.zeros((batch_size, seq_len, seq_len), dtype=jnp.bool_)

    params = {
        "W_q": 0.05 * jax.random.normal(kq, (d_model, d_model), jnp.float32),
        "W_k": 0.05 * jax.random.normal(kk, (d_model, d_model), jnp.float32),
        "W_v": 0.05 * jax.random.normal(kv, (d_model, d_model), jnp.float32),
        "W_o": 0.05 * jax.random.normal(ko, (d_model, d_model), jnp.float32),
    }

    # Masked path (mask given, as in the module's example) and mask-free path.
    out = jax.block_until_ready(
        local_attention_forward(x, mask, params, n_heads, window_size))
    out_nomask = jax.block_until_ready(
        local_attention_forward(x, None, params, n_heads, window_size))

    ref = _reference(x, mask, params, n_heads, window_size)

    assert out.shape == (batch_size, seq_len, d_model)
    assert bool(jnp.all(jnp.isfinite(out)))
    scale_ref = float(jnp.max(jnp.abs(ref))) + 1e-6
    err = float(jnp.max(jnp.abs(out - ref))) / scale_ref
    err_nm = float(jnp.max(jnp.abs(out_nomask - ref))) / scale_ref
    assert err < 5e-2, f"masked path: relative max error {err}"
    assert err_nm < 5e-2, f"mask-free path: relative max error {err_nm}"

    print("KERNEL_OK")
</pallas_src>

<mosaic_0001>
module attributes {stable_mosaic.version = 11 : i64} {
  func.func @_matmul_kernel_single(%arg0: i32, %arg1: i32, %arg2: memref<208x512xbf16, #tpu.memory_space<vmem>>, %arg3: memref<512x512xbf16, #tpu.memory_space<vmem>>, %arg4: memref<208x512xbf16, #tpu.memory_space<vmem>>) attributes {dimension_semantics = [#tpu.dimension_semantics<parallel>, #tpu.dimension_semantics<parallel>], iteration_bounds = array<i64: 1, 3>, scalar_prefetch = 0 : i64, scratch_operands = 0 : i64, tpu.core_type = #tpu.core_type<tc>, window_params = [{transform_indices = @transform_0, window_bounds = array<i64: 208, 512>}, {transform_indices = @transform_1, window_bounds = array<i64: 512, 512>}, {transform_indices = @transform_2, window_bounds = array<i64: 208, 512>}]} {
    %c0 = arith.constant 0 : index
    %c0_0 = arith.constant 0 : index
    %0 = vector.load %arg2[%c0, %c0_0] : memref<208x512xbf16, #tpu.memory_space<vmem>>, vector<208x512xbf16>
    %c0_1 = arith.constant 0 : index
    %c0_2 = arith.constant 0 : index
    %1 = vector.load %arg3[%c0_1, %c0_2] : memref<512x512xbf16, #tpu.memory_space<vmem>>, vector<512x512xbf16>
    %cst = arith.constant dense<0.000000e+00> : vector<208x512xf32>
    %2 = tpu.matmul %0, %1, %cst {dimension_numbers = #tpu.dot_dimension_numbers<[1], [0], [0], [1], [0, 0, 1, 1], [], []>} : vector<208x512xbf16>, vector<512x512xbf16>, vector<208x512xf32> -> vector<208x512xf32>
    %3 = arith.truncf %2 : vector<208x512xf32> to vector<208x512xbf16>
    %c0_3 = arith.constant 0 : index
    %c0_4 = arith.constant 0 : index
    %4 = vector.load %arg4[%c0_3, %c0_4] : memref<208x512xbf16, #tpu.memory_space<vmem>>, vector<208x512xbf16>
    tpu.vector_store %arg4[%c0_3, %c0_4], %3 {strides = array<i32>} : memref<208x512xbf16, #tpu.memory_space<vmem>>, vector<208x512xbf16>,
    return
  }
  func.func @transform_0(%arg0: i32, %arg1: i32) -> (i32, i32) {
    %c0_i32 = arith.constant 0 : i32
    %c0_i32_0 = arith.constant 0 : i32
    return %arg0, %c0_i32 : i32, i32
  }
  func.func @transform_1(%arg0: i32, %arg1: i32) -> (i32, i32) {
    %c0_i32 = arith.constant 0 : i32
    %c0_i32_0 = arith.constant 0 : i32
    return %c0_i32, %arg1 : i32, i32
  }
  func.func @transform_2(%arg0: i32, %arg1: i32) -> (i32, i32) {
    %c0_i32 = arith.constant 0 : i32
    return %arg0, %arg1 : i32, i32
  }
}

</mosaic_0001>

<bundles_post_ra>
// kernel: tpu_custom_call.1
= control target key start
LH: loop header
LB: loop body
LE: loop exit
PB: predicated region body
PF: predicated region fallthrough
CT: control target
= control target key end

     0   :  { %7 = vsyncpa [#allocation3], 0  ;;  %s3770_s0 = inlined_call_operand.hbm [shape: bf16[208,512], index: 0, kind: input, shape index: {}]   ;;  %s3771_s1 = inlined_call_operand.hbm [shape: bf16[512,1536], index: 1, kind: input, shape index: {}]   ;;  %s3772_s2 = inlined_call_operand.hbm [shape: bf16[208,1536], index: 2, kind: output, shape index: {}]  }
   0x1   :  { %8 = vsyncpa [#allocation6], 0 }
   0x2   :  { %10 = vsyncpa [#allocation6 + $0x1], 0 }
   0x3   :  { %11 = vsyncpa [#allocation4], 0 }
   0x4   :  { %13 = vsyncpa [#allocation4 + $0x1], 0  ;;  %s3230_s9 = smov 0   ;;  %s3232_s10 = smov 0  }
   0x5   :  { %s3234_s11 = smov 0   ;;  %s3236_s12 = smov 0  }
   0x6   :  { %s3238_s13 = smov 0   ;;  %s3240_s14 = smov 0  }
   0x7 LB: > { %s2415_s15 = sadd.s32 4294967295, %s3204_s14   ;;  %s2416_s16 = sadd.s32 4294967294, %s3204_s14   ;;  %s3204_s14 = sphi %s3240_s14, %s19_s14   ;;  %s3200_s13 = sphi %s3238_s13, %s3795_s13   ;;  %s3196_s12 = sphi %s3236_s12, %s3794_s12   ;;  %s3192_s11 = sphi %s3234_s11, %s3793_s11   ;;  %s3188_s10 = sphi %s3232_s10, %s3792_s10   ;;  %s3184_s9 = sphi %s3230_s9, %s3791_s9  }
   0x8   : > { %p71_p0 = scmp.ne.s32.totalorder %s3192_s11, %s3188_s10  ;;  %p72_p1 = scmp.eq.s32.totalorder %s3204_s14, 0 }
   0x9   : > { %p77_p2 = scmp.ne.s32.totalorder %s3188_s10, %s3184_s9  ;;  %p3267_p3 = scmp.eq.s32.totalorder %s2415_s15, 0 }
   0xa   : > { %p3271_p4 = por %p72_p1, %p71_p0  ;;  %p103_p5 = scmp.eq.s32.totalorder %s2415_s15, 2 }
   0xb   : > { %p3277_p6 = por %p3267_p3, %p77_p2  ;;  %p109_p7 = scmp.eq.s32.totalorder %s2416_s16, 2 }
   0xc   : > { %p3281_p8 = por %p103_p5, %p71_p0  ;;  %p2417_p9 = scmp.ge.s32.totalorder %s3204_s14, 1 }
   0xd   : > { %s3779_s19 = scalar_select %p3277_p6, 1, 0 }
   0xe   : > { %s3780_s20 = scalar_select %p3281_p8, 1, 0 }
   0xf   : > { %p3286_p10 = por %p109_p7, %p77_p2  ;;  %p116_p11 = scmp.lt.s32.totalorder %s3204_s14, 4 }
  0x10   : > { %s3206_s23 = smov [#allocation2]   ;;  %p2738_p0 = scmp.lt.s32.totalorder %s3204_s14, 3 }
  0x11   : > { %s3781_s21 = scalar_select %p3286_p10, 1, 0 }
  0x12   : > { %p3291_p12 = pnand %p2417_p9, %p116_p11  ;;  %s132_s24 = sshll.u32 %s3206_s23, 4  ;;  %s133_s24 = int_to_ptr.vmem [resolvable:$true] %s132_s24 }
  0x13   : > { %3782 = sst [smem:[#allocation11_spill]] %s3781_s21  ;;  %p3306_p2 = pnand %p2738_p0, %p3271_p4 }
  0x14   : > { %p2725_p13 = pneg %p3291_p12  ;;  %s28_s27 = sadd.s32 1, %s3200_s13 }
  0x15   : > { %s3077_s28 = scalar_lea.vmem %s133_s24, 6656  ;;  %p3085_p10 = scmp.lt.s32.totalorder %s133_s24, %s133_s24 }
  0x16   : > { %p3300_p1 = pnand %p2725_p13, %p3267_p3  ;;  %p3078_p7 = scmp.ne.s32.totalorder %s133_s24, %s3077_s28 }
  0x17   : > { %p3086_p8 = scmp.lt.s32.totalorder %s3077_s28, %s3077_s28 }
  0x18   : > { %p3068_p5 = pneg %p3300_p1 }
  0x19   : > { %p3087_p6 = por %p3086_p8, %p3085_p10 }
  0x1a   : > { %p3080_p9 = pnand %p3078_p7, %p3068_p5 }
  0x1c   : > { %p3081_p11 = pneg %p3080_p9 }
  0x1e   : > { %p3088_p13 = pnand %p3087_p6, %p3081_p11 }
  0x20   : > { %3091 = shalt.err (!%p3088_p13)
}
  0x21   : > { %s3776_s29 = smov 256   ;;  %s3208_s30 = smov 16  }
  0x22   : > { %2728 = dma.hbm_to_vmem [thread:$0]  (!%p3300_p1), %s3770_s0, 6656, %s133_s24, [#allocation3], %s3776_s29, %s3776_s29, %s3208_s30  }
  0x23   : > { %p29_p4 = scmp.ge.s32.totalorder %s28_s27, 3  ;;  %s64_s5 = sadd.s32 1, %s3192_s11 }
  0x24   : > { %s146_s6 = sand.u32 1, %s3192_s11   ;;  %s2662_s15 = sshll.u32 %s3200_s13, 8 }
  0x25   : > { %s3797_s27 = smov (%p29_p4, %s28_s27), 0  ;;  %s2420_s7 = sshll.u32 %s146_s6, 10 }
  0x26   : > { %s61_s8 = ssub.s32 %s3200_s13, %s3797_s27  ;;  %s156_s23 = scalar_lea.hbm %s3771_s1, %s2662_s15 }
  0x27   : > { %p62_p6 = scmp.eq.s32.totalorder %s61_s8, 0  ;;  %s150_s25 = scalar_lea.vmem [#allocation5], %s2420_s7 }
  0x28   : > { %s157_s28 = sshll.u32 %s150_s25, 4  ;;  %s147_s24 = scalar_lea.sflag [#allocation6], %s146_s6  ;;  %s158_s28 = int_to_ptr.vmem [resolvable:$true] %s157_s28 }
  0x29   : > { %s3332_s21 = scalar_select %p62_p6, %s3192_s11, %s64_s5  }
  0x2a   : > { %p3094_p8 = pneg %p3306_p2  ;;  %s3105_s3 = scalar_lea.vmem %s158_s28, 16384 }
  0x2b   : > { %p3106_p10 = scmp.ne.s32.totalorder %s158_s28, %s3105_s3  ;;  %s3209_s4 = smov [#allocation5]  }
  0x2c   : > { %s3110_s29 = sshll.u32 %s3209_s4, 4  ;;  %s3111_s29 = int_to_ptr.vmem [resolvable:$false] %s3110_s29 }
  0x2d   : > { %p3108_p0 = pnand %p3106_p10, %p3094_p8  ;;  %s3112_s8 = scalar_lea.vmem %s3111_s29, 32768 }
  0x2e   : > { %p3113_p5 = scmp.lt.s32.totalorder %s158_s28, %s3111_s29  ;;  %p3114_p7 = scmp.lt.s32.totalorder %s3112_s8, %s3105_s3 }
  0x2f   : > { %p3109_p1 = pneg %p3108_p0 }
  0x30   : > { %p3115_p9 = por %p3114_p7, %p3113_p5 }
  0x32   : > { %p3116_p11 = pnand %p3115_p9, %p3109_p1 }
  0x34   : > { %3119 = shalt.err (!%p3116_p11)
}
  0x35   : > { %s3210_s7 = smov 768   ;;  %s3786_s5 = smov 256  }
  0x36   : > { %2732 = dma.hbm_to_vmem [thread:$0]  (!%p3306_p2), %s156_s23, 16384, %s158_s28, %s147_s24, %s3210_s7, %s3786_s5, %s3208_s30  }
  0x37   : > { %169 = sbr.rel (%p3291_p12) target bundleno = 549 (0x225), region = 28 }
  0x3c   : > { %3171 = dma.done.wait (%p3267_p3), [#allocation3], 6656  }
  0x3d   : > { %3173 = vsyncadd (%p3267_p3), [#allocation3], 4294960640  ;;  %s3347_s29 = sand.u32 1, %s3188_s10   ;;  %p3787_p2 = scmp.ne.s32.totalorder %s3779_s19, 0 }
  0x3e   : > { %s2425_s6 = sshll.u32 %s3347_s29, 10  ;;  %s176_s26 = scalar_lea.sflag [#allocation6], %s3347_s29 }
  0x3f   : > { %s3351_s15 = scalar_lea.vmem [#allocation5], %s2425_s6 }
  0x40   : > { %3175 = dma.done.wait (%p3787_p2), %s176_s26, 16384  }
  0x41   : > { %3177 = vsyncadd (%p3787_p2), %s176_s26, 4294950912  ;;  %v2796_v0 = vld [vmem:[%s3351_s15 + $0xe4] ss:$16 sps:$4 sm:$0xff]   ;;  %v2800_v2 = vld [vmem:[%s3351_s15 + $0xe0] ss:$16 sps:$4 sm:$0xff]   ;;  %s2716_s17 = smul.u32 416, %s3347_s29 }
  0x42   : > { %v2798_v1 = vld [vmem:[%s3351_s15 + $0x2e4] ss:$16 sps:$4 sm:$0xff]   ;;  %1284 = vmatprep.subr.bf16.mxu0 %v2796_v0  ;;  %v2801_v3 = vld [vmem:[%s3351_s15 + $0x2e0] ss:$16 sps:$4 sm:$0xff]   ;;  %v3409_v51 = vld [vmem:[#allocation2 + $0xc] ss:$16 sps:$4 sm:$0xff]  }
  0x43   : > { %1447 = vmatprep.subr.bf16.mxu1 %v2798_v1  ;;  %v2802_v4 = vld [vmem:[%s3351_s15 + $0xc4] ss:$16 sps:$4 sm:$0xff]   ;;  %1285 = vmatpush1.bf16.msra.mxu0 %v2800_v2  ;;  %v2806_v6 = vld [vmem:[%s3351_s15 + $0xc0] ss:$16 sps:$4 sm:$0xff]   ;;  %v2900_v2 = vld [vmem:[%s3351_s15 + $0xec] ss:$16 sps:$4 sm:$0xff]  }
  0x44   : > { %1448 = vmatpush1.bf16.msra.mxu1 %v2801_v3  ;;  %v2804_v5 = vld [vmem:[%s3351_s15 + $0x2c4] ss:$16 sps:$4 sm:$0xff]   ;;  %1286 = vmatprep.subr.bf16.mxu0 %v2802_v4  ;;  %v2807_v7 = vld [vmem:[%s3351_s15 + $0x2c0] ss:$16 sps:$4 sm:$0xff]   ;;  %v2903_v3 = vld [vmem:[%s3351_s15 + $0x2ec] ss:$16 sps:$4 sm:$0xff]  }
  0x45   : > { %1449 = vmatprep.subr.bf16.mxu1 %v2804_v5  ;;  %v2808_v8 = vld [vmem:[%s3351_s15 + $0xa4] ss:$16 sps:$4 sm:$0xff]   ;;  %v2812_v10 = vld [vmem:[%s3351_s15 + $0xa0] ss:$16 sps:$4 sm:$0xff]   ;;  %1479 = vmatprep.mubr.bf16.mxu1 %v3409_v51  ;;  %v3431_v5 = vld [vmem:[#allocation2 + $0x8] ss:$16 sps:$4 sm:$0xff]  }
  0x46   : > { %v2810_v9 = vld [vmem:[%s3351_s15 + $0x2a4] ss:$16 sps:$4 sm:$0xff]   ;;  %v2813_v11 = vld [vmem:[%s3351_s15 + $0x2a0] ss:$16 sps:$4 sm:$0xff]   ;;  %s3660_s19 = scalar_lea.vmem [#allocation7], %s2716_s17  ;;  %s2715_s22 = sshll.u32 %s3196_s12, 8 }
  0x47   : > { %1287 = vmatpush1.bf16.msra.mxu0 %v2806_v6  ;;  %v2814_v12 = vld [vmem:[%s3351_s15 + $0x84] ss:$16 sps:$4 sm:$0xff]   ;;  %v2818_v14 = vld [vmem:[%s3351_s15 + $0x80] ss:$16 sps:$4 sm:$0xff]   ;;  %v2898_v6 = vld [vmem:[%s3351_s15 + $0xe8] ss:$16 sps:$4 sm:$0xff]   ;;  %s3720_s23 = scalar_lea.hbm %s3772_s2, %s2715_s22 }
  0x48   : > { %1450 = vmatpush1.bf16.msra.mxu1 %v2807_v7  ;;  %1288 = vmatprep.subr.bf16.mxu0 %v2808_v8  ;;  %v2816_v13 = vld [vmem:[%s3351_s15 + $0x284] ss:$16 sps:$4 sm:$0xff]   ;;  %v2819_v15 = vld [vmem:[%s3351_s15 + $0x280] ss:$16 sps:$4 sm:$0xff]   ;;  %v2901_v7 = vld [vmem:[%s3351_s15 + $0x2e8] ss:$16 sps:$4 sm:$0xff]  }
  0x49   : > { %1451 = vmatprep.subr.bf16.mxu1 %v2810_v9  ;;  %v2820_v16 = vld [vmem:[%s3351_s15 + $0x64] ss:$16 sps:$4 sm:$0xff]   ;;  %v2824_v18 = vld [vmem:[%s3351_s15 + $0x60] ss:$16 sps:$4 sm:$0xff]   ;;  %v3437_v9 = vld [vmem:[#allocation2 + $0x2c] ss:$16 sps:$4 sm:$0xff]  }
  0x4a   : > { %v2822_v17 = vld [vmem:[%s3351_s15 + $0x264] ss:$16 sps:$4 sm:$0xff]   ;;  %v2825_v19 = vld [vmem:[%s3351_s15 + $0x260] ss:$16 sps:$4 sm:$0xff]   ;;  %s2317_s30 = sshll.u32 %s3660_s19, 4  ;;  %s2301_s12 = scalar_lea.sflag [#allocation4], %s3347_s29  ;;  %s3722_s30 = int_to_ptr.vmem [resolvable:$true] %s2317_s30 }
  0x4b   : > { %1289 = vmatpush1.bf16.msra.mxu0 %v2812_v10  ;;  %v2826_v20 = vld [vmem:[%s3351_s15 + $0x44] ss:$16 sps:$4 sm:$0xff]   ;;  %v2830_v22 = vld [vmem:[%s3351_s15 + $0x40] ss:$16 sps:$4 sm:$0xff]   ;;  %v2910_v10 = vld [vmem:[%s3351_s15 + $0xcc] ss:$16 sps:$4 sm:$0xff]  }
  0x4c   : > { %1452 = vmatpush1.bf16.msra.mxu1 %v2813_v11  ;;  %1290 = vmatprep.subr.bf16.mxu0 %v2814_v12  ;;  %v2828_v21 = vld [vmem:[%s3351_s15 + $0x244] ss:$16 sps:$4 sm:$0xff]   ;;  %v2831_v23 = vld [vmem:[%s3351_s15 + $0x240] ss:$16 sps:$4 sm:$0xff]   ;;  %v2913_v11 = vld [vmem:[%s3351_s15 + $0x2cc] ss:$16 sps:$4 sm:$0xff]  }
  0x4d   : > { %1453 = vmatprep.subr.bf16.mxu1 %v2816_v13  ;;  %v2832_v24 = vld [vmem:[%s3351_s15 + $0x24] ss:$16 sps:$4 sm:$0xff]   ;;  %v2836_v26 = vld [vmem:[%s3351_s15 + $0x20] ss:$16 sps:$4 sm:$0xff]   ;;  %v2908_v12 = vld [vmem:[%s3351_s15 + $0xc8] ss:$16 sps:$4 sm:$0xff]  }
  0x4e   : > { %v2834_v25 = vld [vmem:[%s3351_s15 + $0x224] ss:$16 sps:$4 sm:$0xff]   ;;  %v2837_v27 = vld [vmem:[%s3351_s15 + $0x220] ss:$16 sps:$4 sm:$0xff]   ;;  %v2911_v13 = vld [vmem:[%s3351_s15 + $0x2c8] ss:$16 sps:$4 sm:$0xff]  }
  0x4f   : > { %1291 = vmatpush1.bf16.msra.mxu0 %v2818_v14  ;;  %v2838_v28 = vld [vmem:[%s3351_s15 + $0x4] ss:$16 sps:$4 sm:$0xff]   ;;  %v2842_v30 = vld [vmem:[%s3351_s15] ss:$16 sps:$4 sm:$0xff]   ;;  %v2918_v14 = vld [vmem:[%s3351_s15 + $0xac] ss:$16 sps:$4 sm:$0xff]  }
  0x50   : > { %1454 = vmatpush1.bf16.msra.mxu1 %v2819_v15  ;;  %1292 = vmatprep.subr.bf16.mxu0 %v2820_v16  ;;  %v2840_v29 = vld [vmem:[%s3351_s15 + $0x204] ss:$16 sps:$4 sm:$0xff]   ;;  %v2843_v31 = vld [vmem:[%s3351_s15 + $0x200] ss:$16 sps:$4 sm:$0xff]   ;;  %v2921_v16 = vld [vmem:[%s3351_s15 + $0x2ac] ss:$16 sps:$4 sm:$0xff]  }
  0x51   : > { %1455 = vmatprep.subr.bf16.mxu1 %v2822_v17  ;;  %v2844_v32 = vld [vmem:[%s3351_s15 + $0x1e4] ss:$16 sps:$4 sm:$0xff]   ;;  %v2848_v34 = vld [vmem:[%s3351_s15 + $0x1e0] ss:$16 sps:$4 sm:$0xff]   ;;  %v3451_v17 = vld [vmem:[#allocation2 + $0x28] ss:$16 sps:$4 sm:$0xff]  }
  0x52   : > { %v2846_v33 = vld [vmem:[%s3351_s15 + $0x3e4] ss:$16 sps:$4 sm:$0xff]   ;;  %v2849_v35 = vld [vmem:[%s3351_s15 + $0x3e0] ss:$16 sps:$4 sm:$0xff]   ;;  %s3120_s25 = scalar_lea.vmem %s3722_s30, 6656  ;;  %p3788_p12 = scmp.ne.s32.totalorder %s3780_s20, 0 }
  0x53   : > { %1293 = vmatpush1.bf16.msra.mxu0 %v2824_v18  ;;  %v2850_v36 = vld [vmem:[%s3351_s15 + $0x1c4] ss:$16 sps:$4 sm:$0xff]   ;;  %v2854_v38 = vld [vmem:[%s3351_s15 + $0x1c0] ss:$16 sps:$4 sm:$0xff]   ;;  %v2916_v18 = vld [vmem:[%s3351_s15 + $0xa8] ss:$16 sps:$4 sm:$0xff]   ;;  %p3121_p3 = scmp.ne.s32.totalorder %s3722_s30, %s3120_s25 }
  0x54   : > { %1456 = vmatpush1.bf16.msra.mxu1 %v2825_v19  ;;  %1294 = vmatprep.subr.bf16.mxu0 %v2826_v20  ;;  %v2852_v37 = vld [vmem:[%s3351_s15 + $0x3c4] ss:$16 sps:$4 sm:$0xff]   ;;  %v2855_v39 = vld [vmem:[%s3351_s15 + $0x3c0] ss:$16 sps:$4 sm:$0xff]   ;;  %v2919_v19 = vld [vmem:[%s3351_s15 + $0x2a8] ss:$16 sps:$4 sm:$0xff]  }
  0x55   : > { %1457 = vmatprep.subr.bf16.mxu1 %v2828_v21  ;;  %v2856_v40 = vld [vmem:[%s3351_s15 + $0x1a4] ss:$16 sps:$4 sm:$0xff]   ;;  %v2860_v42 = vld [vmem:[%s3351_s15 + $0x1a0] ss:$16 sps:$4 sm:$0xff]   ;;  %v3457_v21 = vld [vmem:[#allocation2 + $0x4c] ss:$16 sps:$4 sm:$0xff]   ;;  %p3122_p13 = pnand %p3121_p3, %p3788_p12 }
  0x56   : > { %v2858_v41 = vld [vmem:[%s3351_s15 + $0x3a4] ss:$16 sps:$4 sm:$0xff]   ;;  %v2861_v43 = vld [vmem:[%s3351_s15 + $0x3a0] ss:$16 sps:$4 sm:$0xff]   ;;  %s3211_s28 = smov [#allocation7]  }
  0x57   : > { %1295 = vmatpush1.bf16.msra.mxu0 %v2830_v22  ;;  %v2862_v44 = vld [vmem:[%s3351_s15 + $0x184] ss:$16 sps:$4 sm:$0xff]   ;;  %v2866_v46 = vld [vmem:[%s3351_s15 + $0x180] ss:$16 sps:$4 sm:$0xff]   ;;  %v2930_v22 = vld [vmem:[%s3351_s15 + $0x8c] ss:$16 sps:$4 sm:$0xff]   ;;  %p3123_p4 = pneg %p3122_p13 }
  0x58   : > { %1458 = vmatpush1.bf16.msra.mxu1 %v2831_v23  ;;  %1296 = vmatprep.subr.bf16.mxu0 %v2832_v24  ;;  %v2864_v45 = vld [vmem:[%s3351_s15 + $0x384] ss:$16 sps:$4 sm:$0xff]   ;;  %v2867_v47 = vld [vmem:[%s3351_s15 + $0x380] ss:$16 sps:$4 sm:$0xff]   ;;  %v2933_v23 = vld [vmem:[%s3351_s15 + $0x28c] ss:$16 sps:$4 sm:$0xff]  }
  0x59   : > { %1459 = vmatprep.subr.bf16.mxu1 %v2834_v25  ;;  %v2868_v48 = vld [vmem:[%s3351_s15 + $0x164] ss:$16 sps:$4 sm:$0xff]   ;;  %v2872_v52 = vld [vmem:[%s3351_s15 + $0x160] ss:$16 sps:$4 sm:$0xff]   ;;  %v2928_v24 = vld [vmem:[%s3351_s15 + $0x88] ss:$16 sps:$4 sm:$0xff]  }
  0x5a   : > { %v3406_v49 = vld [vmem:[#allocation2 + $0x4] ss:$16 sps:$4 sm:$0xff]   ;;  %v2873_v53 = vld [vmem:[%s3351_s15 + $0x360] ss:$16 sps:$4 sm:$0xff]   ;;  %v2931_v25 = vld [vmem:[%s3351_s15 + $0x288] ss:$16 sps:$4 sm:$0xff]  }
  0x5b   : > { %1297 = vmatpush1.bf16.msra.mxu0 %v2836_v26  ;;  %v2870_v50 = vld [vmem:[%s3351_s15 + $0x364] ss:$16 sps:$4 sm:$0xff]   ;;  %1316 = vmatprep.mubr.bf16.mxu0 %v3406_v49  ;;  %v2878_v56 = vld [vmem:[%s3351_s15 + $0x140] ss:$16 sps:$4 sm:$0xff]   ;;  %v2942_v26 = vld [vmem:[%s3351_s15 + $0x6c] ss:$16 sps:$4 sm:$0xff]  }
  0x5c   : > { %1460 = vmatpush1.bf16.msra.mxu1 %v2837_v27  ;;  %1298 = vmatprep.subr.bf16.mxu0 %v2838_v28  ;;  %v2874_v54 = vld [vmem:[%s3351_s15 + $0x144] ss:$16 sps:$4 sm:$0xff]   ;;  %v2879_v57 = vld [vmem:[%s3351_s15 + $0x340] ss:$16 sps:$4 sm:$0xff]   ;;  %v2945_v27 = vld [vmem:[%s3351_s15 + $0x26c] ss:$16 sps:$4 sm:$0xff]  }
  0x5d   : > { %1461 = vmatprep.subr.bf16.mxu1 %v2840_v29  ;;  %v2876_v55 = vld [vmem:[%s3351_s15 + $0x344] ss:$16 sps:$4 sm:$0xff]   ;;  %v2884_v60 = vld [vmem:[%s3351_s15 + $0x120] ss:$16 sps:$4 sm:$0xff]   ;;  %v3471_v29 = vld [vmem:[#allocation2 + $0x48] ss:$16 sps:$4 sm:$0xff]  }
  0x5e   : > { %v2880_v58 = vld [vmem:[%s3351_s15 + $0x124] ss:$16 sps:$4 sm:$0xff]   ;;  %v2885_v61 = vld [vmem:[%s3351_s15 + $0x320] ss:$16 sps:$4 sm:$0xff]   ;;  %s3124_s24 = sshll.u32 %s3211_s28, 4  ;;  %s3125_s24 = int_to_ptr.vmem [resolvable:$false] %s3124_s24 }
  0x5f   : > { %1299 = vmatpush1.bf16.msra.mxu0 %v2842_v30  ;;  %v2882_v59 = vld [vmem:[%s3351_s15 + $0x324] ss:$16 sps:$4 sm:$0xff]   ;;  %v2890_v0 = vld [vmem:[%s3351_s15 + $0x100] ss:$16 sps:$4 sm:$0xff]   ;;  %s3126_s3 = scalar_lea.vmem %s3125_s24, 13312  ;;  %p3127_p6 = scmp.lt.s32.totalorder %s3722_s30, %s3125_s24 }
  0x60   : > { %1462 = vmatpush1.bf16.msra.mxu1 %v2843_v31  ;;  %1300 = vmatprep.subr.bf16.mxu0 %v2844_v32  ;;  %v2886_v62 = vld [vmem:[%s3351_s15 + $0x104] ss:$16 sps:$4 sm:$0xff]   ;;  %v2891_v1 = vld [vmem:[%s3351_s15 + $0x300] ss:$16 sps:$4 sm:$0xff]   ;;  %v3475_v31 = vld [vmem:[#allocation2 + $0x6c] ss:$16 sps:$4 sm:$0xff]   ;;  %p3128_p8 = scmp.lt.s32.totalorder %s3126_s3, %s3120_s25 }
  0x61   : > { %1463 = vmatprep.subr.bf16.mxu1 %v2846_v33  ;;  %v2888_v63 = vld [vmem:[%s3351_s15 + $0x304] ss:$16 sps:$4 sm:$0xff]   ;;  %v3429_v4 = vld [vmem:[#allocation2] ss:$16 sps:$4 sm:$0xff]   ;;  %v2940_v32 = vld [vmem:[%s3351_s15 + $0x68] ss:$16 sps:$4 sm:$0xff]  }
  0x62   : > { %v3435_v8 = vld [vmem:[#allocation2 + $0x24] ss:$16 sps:$4 sm:$0xff]   ;;  %v3448_v15 = vld [vmem:[#allocation2 + $0x20] ss:$16 sps:$4 sm:$0xff]   ;;  %v2943_v33 = vld [vmem:[%s3351_s15 + $0x268] ss:$16 sps:$4 sm:$0xff]   ;;  %p3129_p10 = por %p3128_p8, %p3127_p6 }
  0x63   : > { %1301 = vmatpush2.bf16.msra.mxu0 %v2848_v34  ;;  %v3455_v20 = vld [vmem:[#allocation2 + $0x44] ss:$16 sps:$4 sm:$0xff]   ;;  %v3469_v28 = vld [vmem:[#allocation2 + $0x40] ss:$16 sps:$4 sm:$0xff]   ;;  %v2954_v34 = vld [vmem:[%s3351_s15 + $0x4c] ss:$16 sps:$4 sm:$0xff]  }
  0x64   : > { %1464 = vmatpush2.bf16.msra.mxu1 %v2849_v35  ;;  %1302 = vmatprep.subr.bf16.mxu0 %v2850_v36  ;;  %v3473_v30 = vld [vmem:[#allocation2 + $0x64] ss:$16 sps:$4 sm:$0xff]   ;;  %v2957_v35 = vld [vmem:[%s3351_s15 + $0x24c] ss:$16 sps:$4 sm:$0xff]   ;;  %v2952_v36 = vld [vmem:[%s3351_s15 + $0x48] ss:$16 sps:$4 sm:$0xff]   ;;  %p3130_p0 = pnand %p3129_p10, %p3123_p4 }
  0x65   : > { %1465 = vmatprep.subr.bf16.mxu1 %v2852_v37  ;;  %v2955_v37 = vld [vmem:[%s3351_s15 + $0x248] ss:$16 sps:$4 sm:$0xff]  }
  0x67   : > { %1303 = vmatpush2.bf16.msra.mxu0 %v2854_v38  ;;  %v3487_v38 = vld [vmem:[#allocation2 + $0x60] ss:$16 sps:$4 sm:$0xff]  }
  0x68   : > { %1466 = vmatpush2.bf16.msra.mxu1 %v2855_v39  ;;  %1304 = vmatprep.subr.bf16.mxu0 %v2856_v40  ;;  %v2964_v39 = vld [vmem:[%s3351_s15 + $0x2c] ss:$16 sps:$4 sm:$0xff]  }
  0x69   : > { %1467 = vmatprep.subr.bf16.mxu1 %v2858_v41  ;;  %v2967_v40 = vld [vmem:[%s3351_s15 + $0x22c] ss:$16 sps:$4 sm:$0xff]   ;;  %v3491_v41 = vld [vmem:[#allocation2 + $0x68] ss:$16 sps:$4 sm:$0xff]  }
  0x6b   : > { %1305 = vmatpush2.bf16.msra.mxu0 %v2860_v42  ;;  %v3493_v42 = vld [vmem:[#allocation2 + $0x84] ss:$16 sps:$4 sm:$0xff]  }
  0x6c   : > { %1468 = vmatpush2.bf16.msra.mxu1 %v2861_v43  ;;  %1306 = vmatprep.subr.bf16.mxu0 %v2862_v44  ;;  %v3495_v43 = vld [vmem:[#allocation2 + $0x8c] ss:$16 sps:$4 sm:$0xff]   ;;  %v2962_v44 = vld [vmem:[%s3351_s15 + $0x28] ss:$16 sps:$4 sm:$0xff]  }
  0x6d   : > { %1469 = vmatprep.subr.bf16.mxu1 %v2864_v45  ;;  %v2965_v45 = vld [vmem:[%s3351_s15 + $0x228] ss:$16 sps:$4 sm:$0xff]  }
  0x6f   : > { %1307 = vmatpush2.bf16.msra.mxu0 %v2866_v46  ;;  %v2972_v46 = vld [vmem:[%s3351_s15 + $0xc] ss:$16 sps:$4 sm:$0xff]  }
  0x70   : > { %1470 = vmatpush2.bf16.msra.mxu1 %v2867_v47  ;;  %1308 = vmatprep.subr.bf16.mxu0 %v2868_v48  ;;  %v2975_v47 = vld [vmem:[%s3351_s15 + $0x20c] ss:$16 sps:$4 sm:$0xff]   ;;  %v2970_v48 = vld [vmem:[%s3351_s15 + $0x8] ss:$16 sps:$4 sm:$0xff]  }
  0x71   : > { %1471 = vmatprep.subr.bf16.mxu1 %v2870_v50  ;;  %v3506_v50 = vld [vmem:[#allocation2 + $0x80] ss:$16 sps:$4 sm:$0xff]  }
  0x73   : > { %1309 = vmatpush2.bf16.msra.mxu0 %v2872_v52  ;;  %v3508_v52 = vld [vmem:[#allocation2 + $0x88] ss:$16 sps:$4 sm:$0xff]  }
  0x74   : > { %1472 = vmatpush2.bf16.msra.mxu1 %v2873_v53  ;;  %1310 = vmatprep.subr.bf16.mxu0 %v2874_v54  ;;  %v2973_v53 = vld [vmem:[%s3351_s15 + $0x208] ss:$16 sps:$4 sm:$0xff]   ;;  %v2984_v54 = vld [vmem:[%s3351_s15 + $0x1ec] ss:$16 sps:$4 sm:$0xff]  }
  0x75   : > { %1473 = vmatprep.subr.bf16.mxu1 %v2876_v55  ;;  %v2987_v55 = vld [vmem:[%s3351_s15 + $0x3ec] ss:$16 sps:$4 sm:$0xff]  }
  0x77   : > { %1311 = vmatpush2.bf16.msra.mxu0 %v2878_v56  ;;  %v3513_v56 = vld [vmem:[#allocation2 + $0xa4] ss:$16 sps:$4 sm:$0xff]  }
  0x78   : > { %1474 = vmatpush2.bf16.msra.mxu1 %v2879_v57  ;;  %1312 = vmatprep.subr.bf16.mxu0 %v2880_v58  ;;  %v3515_v57 = vld [vmem:[#allocation2 + $0xac] ss:$16 sps:$4 sm:$0xff]   ;;  %v2982_v58 = vld [vmem:[%s3351_s15 + $0x1e8] ss:$16 sps:$4 sm:$0xff]  }
  0x79   : > { %1475 = vmatprep.subr.bf16.mxu1 %v2882_v59  ;;  %v2985_v59 = vld [vmem:[%s3351_s15 + $0x3e8] ss:$16 sps:$4 sm:$0xff]  }
  0x7b   : > { %1313 = vmatpush2.bf16.msra.mxu0 %v2884_v60  ;;  %v2996_v60 = vld [vmem:[%s3351_s15 + $0x1cc] ss:$16 sps:$4 sm:$0xff]  }
  0x7c   : > { %1476 = vmatpush2.bf16.msra.mxu1 %v2885_v61  ;;  %1314 = vmatprep.subr.bf16.mxu0 %v2886_v62  ;;  %v2999_v61 = vld [vmem:[%s3351_s15 + $0x3cc] ss:$16 sps:$4 sm:$0xff]   ;;  %v2994_v62 = vld [vmem:[%s3351_s15 + $0x1c8] ss:$16 sps:$4 sm:$0xff]  }
  0x7d   : > { %1477 = vmatprep.subr.bf16.mxu1 %v2888_v63  ;;  %v3526_v63 = vld [vmem:[#allocation2 + $0xa0] ss:$16 sps:$4 sm:$0xff]  }
  0x7f   : > { %1315 = vmatpush2.bf16.msra.mxu0 %v2890_v0  ;;  %v3528_v0 = vld [vmem:[#allocation2 + $0xa8] ss:$16 sps:$4 sm:$0xff]  }
  0x80   : > { %1478 = vmatpush2.bf16.msra.mxu1 %v2891_v1  ;;  %1610 = vmatprep.subr.bf16.mxu0 %v2900_v2  ;;  %v2997_v1 = vld [vmem:[%s3351_s15 + $0x3c8] ss:$16 sps:$4 sm:$0xff]   ;;  %v3008_v2 = vld [vmem:[%s3351_s15 + $0x1ac] ss:$16 sps:$4 sm:$0xff]  }
  0x81   : > { %1773 = vmatprep.subr.bf16.mxu1 %v2903_v3  ;;  %v3011_v3 = vld [vmem:[%s3351_s15 + $0x3ac] ss:$16 sps:$4 sm:$0xff]  }
  0x82   : > { %1317 = vmatmul.mubr.bf16.vlgmr.msra.gmra.mxu0 %v3429_v4 }
  0x83   : > { %1480 = vmatmul.mubr.bf16.vlgmr.msra.gmra.mxu1 %v3431_v5  ;;  %1611 = vmatpush1.bf16.msra.mxu0 %v2898_v6  ;;  %v3533_v6 = vld [vmem:[#allocation2 + $0xc4] ss:$16 sps:$4 sm:$0xff]  }
  0x84   : > { %1774 = vmatpush1.bf16.msra.mxu1 %v2901_v7  ;;  %1326 = vmatprep.mubr.bf16.mxu0 %v3435_v8  ;;  %v3535_v7 = vld [vmem:[#allocation2 + $0xcc] ss:$16 sps:$4 sm:$0xff]  }
  0x85   : > { %1489 = vmatprep.mubr.bf16.mxu1 %v3437_v9  ;;  %1612 = vmatprep.subr.bf16.mxu0 %v2910_v10  ;;  %v3006_v10 = vld [vmem:[%s3351_s15 + $0x1a8] ss:$16 sps:$4 sm:$0xff]  }
  0x86   : > { %1775 = vmatprep.subr.bf16.mxu1 %v2913_v11  ;;  %v3009_v11 = vld [vmem:[%s3351_s15 + $0x3a8] ss:$16 sps:$4 sm:$0xff]  }
  0x87   : > { %1613 = vmatpush1.bf16.msra.mxu0 %v2908_v12  ;;  %v3020_v12 = vld [vmem:[%s3351_s15 + $0x18c] ss:$16 sps:$4 sm:$0xff]  }
  0x88   : > { %1776 = vmatpush1.bf16.msra.mxu1 %v2911_v13  ;;  %1614 = vmatprep.subr.bf16.mxu0 %v2918_v14  ;;  %v3023_v13 = vld [vmem:[%s3351_s15 + $0x38c] ss:$16 sps:$4 sm:$0xff]   ;;  %v3018_v14 = vld [vmem:[%s3351_s15 + $0x188] ss:$16 sps:$4 sm:$0xff]  }
  0x89   : > { %1777 = vmatprep.subr.bf16.mxu1 %v2921_v16  ;;  %v3021_v16 = vld [vmem:[%s3351_s15 + $0x388] ss:$16 sps:$4 sm:$0xff]  }
  0x8a   : > { %1327 = vmatmul.mubr.bf16.gmra.mxu0 %v3448_v15 }
  0x8b   : > { %1490 = vmatmul.mubr.bf16.gmra.mxu1 %v3451_v17  ;;  %1615 = vmatpush1.bf16.msra.mxu0 %v2916_v18  ;;  %v3547_v18 = vld [vmem:[#allocation2 + $0xc0] ss:$16 sps:$4 sm:$0xff]  }
  0x8c   : > { %1778 = vmatpush1.bf16.msra.mxu1 %v2919_v19  ;;  %1336 = vmatprep.mubr.bf16.mxu0 %v3455_v20  ;;  %v3026_v19 = vld [vmem:[%s3351_s15 + $0x16c] ss:$16 sps:$4 sm:$0xff]  }
  0x8d   : > { %1499 = vmatprep.mubr.bf16.mxu1 %v3457_v21  ;;  %1616 = vmatprep.subr.bf16.mxu0 %v2930_v22  ;;  %v3029_v22 = vld [vmem:[%s3351_s15 + $0x36c] ss:$16 sps:$4 sm:$0xff]  }
  0x8e   : > { %1779 = vmatprep.subr.bf16.mxu1 %v2933_v23  ;;  %v3551_v23 = vld [vmem:[#allocation2 + $0xc8] ss:$16 sps:$4 sm:$0xff]  }
  0x8f   : > { %1617 = vmatpush1.bf16.msra.mxu0 %v2928_v24  ;;  %v3553_v24 = vld [vmem:[#allocation2 + $0xe4] ss:$16 sps:$4 sm:$0xff]  }
  0x90   : > { %1780 = vmatpush1.bf16.msra.mxu1 %v2931_v25  ;;  %1618 = vmatprep.subr.bf16.mxu0 %v2942_v26  ;;  %v3555_v25 = vld [vmem:[#allocation2 + $0xec] ss:$16 sps:$4 sm:$0xff]   ;;  %v3024_v26 = vld [vmem:[%s3351_s15 + $0x168] ss:$16 sps:$4 sm:$0xff]  }
  0x91   : > { %1781 = vmatprep.subr.bf16.mxu1 %v2945_v27  ;;  %v3027_v27 = vld [vmem:[%s3351_s15 + $0x368] ss:$16 sps:$4 sm:$0xff]  }
  0x92   : > { %1337 = vmatmul.mubr.bf16.gmra.mxu0 %v3469_v28 }
  0x93   : > { %1500 = vmatmul.mubr.bf16.gmra.mxu1 %v3471_v29  ;;  %1346 = vmatprep.mubr.bf16.mxu0 %v3473_v30 }
  0x94   : > { %1509 = vmatprep.mubr.bf16.mxu1 %v3475_v31  ;;  %1619 = vmatpush1.bf16.msra.mxu0 %v2940_v32  ;;  %v3038_v32 = vld [vmem:[%s3351_s15 + $0x14c] ss:$16 sps:$4 sm:$0xff]  }
  0x95   : > { %1782 = vmatpush1.bf16.msra.mxu1 %v2943_v33  ;;  %1620 = vmatprep.subr.bf16.mxu0 %v2954_v34  ;;  %v3041_v33 = vld [vmem:[%s3351_s15 + $0x34c] ss:$16 sps:$4 sm:$0xff]   ;;  %v3036_v34 = vld [vmem:[%s3351_s15 + $0x148] ss:$16 sps:$4 sm:$0xff]  }
  0x96   : > { %1783 = vmatprep.subr.bf16.mxu1 %v2957_v35  ;;  %v3039_v35 = vld [vmem:[%s3351_s15 + $0x348] ss:$16 sps:$4 sm:$0xff]  }
  0x98   : > { %1621 = vmatpush1.bf16.msra.mxu0 %v2952_v36  ;;  %v3050_v36 = vld [vmem:[%s3351_s15 + $0x12c] ss:$16 sps:$4 sm:$0xff]  }
  0x99   : > { %1784 = vmatpush1.bf16.msra.mxu1 %v2955_v37  ;;  %1622 = vmatprep.subr.bf16.mxu0 %v2964_v39  ;;  %v3053_v37 = vld [vmem:[%s3351_s15 + $0x32c] ss:$16 sps:$4 sm:$0xff]   ;;  %v3569_v39 = vld [vmem:[#allocation2 + $0xe0] ss:$16 sps:$4 sm:$0xff]  }
  0x9a   : > { %1785 = vmatprep.subr.bf16.mxu1 %v2967_v40  ;;  %1347 = vmatmul.mubr.bf16.gmra.mxu0 %v3487_v38  ;;  %v3571_v40 = vld [vmem:[#allocation2 + $0xe8] ss:$16 sps:$4 sm:$0xff]  }
  0x9b   : > { %1510 = vmatmul.mubr.bf16.gmra.mxu1 %v3491_v41  ;;  %1356 = vmatprep.mubr.bf16.mxu0 %v3493_v42 }
  0x9c   : > { %1519 = vmatprep.mubr.bf16.mxu1 %v3495_v43  ;;  %1623 = vmatpush1.bf16.msra.mxu0 %v2962_v44  ;;  %v3573_v44 = vld [vmem:[#allocation2 + $0x104] ss:$16 sps:$4 sm:$0xff]  }
  0x9d   : > { %1786 = vmatpush1.bf16.msra.mxu1 %v2965_v45  ;;  %1624 = vmatprep.subr.bf16.mxu0 %v2972_v46  ;;  %v3575_v45 = vld [vmem:[#allocation2 + $0x10c] ss:$16 sps:$4 sm:$0xff]   ;;  %v3048_v46 = vld [vmem:[%s3351_s15 + $0x128] ss:$16 sps:$4 sm:$0xff]  }
  0x9e   : > { %1787 = vmatprep.subr.bf16.mxu1 %v2975_v47  ;;  %v3051_v47 = vld [vmem:[%s3351_s15 + $0x328] ss:$16 sps:$4 sm:$0xff]  }
  0xa0   : > { %1625 = vmatpush1.bf16.msra.mxu0 %v2970_v48  ;;  %v3062_v48 = vld [vmem:[%s3351_s15 + $0x10c] ss:$16 sps:$4 sm:$0xff]  }
  0xa1   : > { %1788 = vmatpush1.bf16.msra.mxu1 %v2973_v53  ;;  %1626 = vmatprep.subr.bf16.mxu0 %v2984_v54  ;;  %v3065_v53 = vld [vmem:[%s3351_s15 + $0x30c] ss:$16 sps:$4 sm:$0xff]   ;;  %v3060_v54 = vld [vmem:[%s3351_s15 + $0x108] ss:$16 sps:$4 sm:$0xff]  }
  0xa2   : > { %1789 = vmatprep.subr.bf16.mxu1 %v2987_v55  ;;  %1357 = vmatmul.mubr.bf16.gmra.mxu0 %v3506_v50  ;;  %v3063_v55 = vld [vmem:[%s3351_s15 + $0x308] ss:$16 sps:$4 sm:$0xff]  }
  0xa3   : > { %1520 = vmatmul.mubr.bf16.gmra.mxu1 %v3508_v52  ;;  %1366 = vmatprep.mubr.bf16.mxu0 %v3513_v56 }
  0xa4   : > { %1529 = vmatprep.mubr.bf16.mxu1 %v3515_v57  ;;  %1627 = vmatpush2.bf16.msra.mxu0 %v2982_v58  ;;  %v3587_v58 = vld [vmem:[#allocation2 + $0x100] ss:$16 sps:$4 sm:$0xff]  }
  0xa5   : > { %1790 = vmatpush2.bf16.msra.mxu1 %v2985_v59  ;;  %1628 = vmatprep.subr.bf16.mxu0 %v2996_v60  ;;  %v3589_v59 = vld [vmem:[#allocation2 + $0x108] ss:$16 sps:$4 sm:$0xff]   ;;  %v3591_v60 = vld [vmem:[#allocation2 + $0x124] ss:$16 sps:$4 sm:$0xff]  }
  0xa6   : > { %1791 = vmatprep.subr.bf16.mxu1 %v2999_v61  ;;  %v3593_v61 = vld [vmem:[#allocation2 + $0x12c] ss:$16 sps:$4 sm:$0xff]  }
  0xa8   : > { %1629 = vmatpush2.bf16.msra.mxu0 %v2994_v62  ;;  %v3599_v62 = vld [vmem:[#allocation2 + $0x120] ss:$16 sps:$4 sm:$0xff]  }
  0xa9   : > { %1792 = vmatpush2.bf16.msra.mxu1 %v2997_v1  ;;  %1630 = vmatprep.subr.bf16.mxu0 %v3008_v2  ;;  %v3601_v1 = vld [vmem:[#allocation2 + $0x128] ss:$16 sps:$4 sm:$0xff]   ;;  %v3603_v2 = vld [vmem:[#allocation2 + $0x144] ss:$16 sps:$4 sm:$0xff]  }
  0xaa   : > { %1793 = vmatprep.subr.bf16.mxu1 %v3011_v3  ;;  %1367 = vmatmul.mubr.bf16.gmra.mxu0 %v3526_v63  ;;  %v3605_v3 = vld [vmem:[#allocation2 + $0x14c] ss:$16 sps:$4 sm:$0xff]  }
  0xab   : > { %1530 = vmatmul.mubr.bf16.gmra.mxu1 %v3528_v0  ;;  %1376 = vmatprep.mubr.bf16.mxu0 %v3533_v6 }
  0xac   : > { %1539 = vmatprep.mubr.bf16.mxu1 %v3535_v7  ;;  %1631 = vmatpush2.bf16.msra.mxu0 %v3006_v10  ;;  %v3034_v10 = vld [vmem:[#allocation2 + $0x140] ss:$16 sps:$4 sm:$0xff]  }
  0xad   : > { %1794 = vmatpush2.bf16.msra.mxu1 %v3009_v11  ;;  %1632 = vmatprep.subr.bf16.mxu0 %v3020_v12  ;;  %v3035_v11 = vld [vmem:[#allocation2 + $0x148] ss:$16 sps:$4 sm:$0xff]   ;;  %v3042_v12 = vld [vmem:[#allocation2 + $0x164] ss:$16 sps:$4 sm:$0xff]  }
  0xae   : > { %1795 = vmatprep.subr.bf16.mxu1 %v3023_v13  ;;  %v3044_v13 = vld [vmem:[#allocation2 + $0x16c] ss:$16 sps:$4 sm:$0xff]  }
  0xb0   : > { %1633 = vmatpush2.bf16.msra.mxu0 %v3018_v14  ;;  %v3046_v14 = vld [vmem:[#allocation2 + $0x160] ss:$16 sps:$4 sm:$0xff]  }
  0xb1   : > { %1796 = vmatpush2.bf16.msra.mxu1 %v3021_v16  ;;  %1634 = vmatprep.subr.bf16.mxu0 %v3026_v19  ;;  %v3047_v16 = vld [vmem:[#allocation2 + $0x168] ss:$16 sps:$4 sm:$0xff]   ;;  %v3054_v19 = vld [vmem:[#allocation2 + $0x184] ss:$16 sps:$4 sm:$0xff]  }
  0xb2   : > { %1797 = vmatprep.subr.bf16.mxu1 %v3029_v22  ;;  %1377 = vmatmul.mubr.bf16.gmra.mxu0 %v3547_v18  ;;  %v3056_v22 = vld [vmem:[#allocation2 + $0x18c] ss:$16 sps:$4 sm:$0xff]  }
  0xb3   : > { %1540 = vmatmul.mubr.bf16.gmra.mxu1 %v3551_v23  ;;  %1386 = vmatprep.mubr.bf16.mxu0 %v3553_v24 }
  0xb4   : > { %1549 = vmatprep.mubr.bf16.mxu1 %v3555_v25  ;;  %1635 = vmatpush2.bf16.msra.mxu0 %v3024_v26  ;;  %v3611_v26 = vld [vmem:[#allocation2 + $0x180] ss:$16 sps:$4 sm:$0xff]  }
  0xb5   : > { %1798 = vmatpush2.bf16.msra.mxu1 %v3027_v27  ;;  %1636 = vmatprep.subr.bf16.mxu0 %v3038_v32  ;;  %v3613_v27 = vld [vmem:[#allocation2 + $0x188] ss:$16 sps:$4 sm:$0xff]  }
  0xb6   : > { %1799 = vmatprep.subr.bf16.mxu1 %v3041_v33 }
  0xb8   : > { %1637 = vmatpush2.bf16.msra.mxu0 %v3036_v34 }
  0xb9   : > { %1800 = vmatpush2.bf16.msra.mxu1 %v3039_v35  ;;  %1638 = vmatprep.subr.bf16.mxu0 %v3050_v36 }
  0xba   : > { %1801 = vmatprep.subr.bf16.mxu1 %v3053_v37  ;;  %1387 = vmatmul.mubr.bf16.gmra.mxu0 %v3569_v39 }
  0xbb   : > { %1550 = vmatmul.mubr.bf16.gmra.mxu1 %v3571_v40  ;;  %1396 = vmatprep.mubr.bf16.mxu0 %v3573_v44 }
  0xbc   : > { %1559 = vmatprep.mubr.bf16.mxu1 %v3575_v45  ;;  %1639 = vmatpush2.bf16.msra.mxu0 %v3048_v46 }
  0xbd   : > { %1802 = vmatpush2.bf16.msra.mxu1 %v3051_v47  ;;  %1640 = vmatprep.subr.bf16.mxu0 %v3062_v48 }
  0xbe   : > { %1803 = vmatprep.subr.bf16.mxu1 %v3065_v53 }
  0xc0   : > { %1641 = vmatpush2.bf16.msra.mxu0 %v3060_v54 }
  0xc1   : > { %1804 = vmatpush2.bf16.msra.mxu1 %v3063_v55 }
  0xc2   : > { %1397 = vmatmul.mubr.bf16.gmra.mxu0 %v3587_v58 }
  0xc3   : > { %1560 = vmatmul.mubr.bf16.gmra.mxu1 %v3589_v59  ;;  %1406 = vmatprep.mubr.bf16.mxu0 %v3591_v60 }
  0xc4   : > { %1569 = vmatprep.mubr.bf16.mxu1 %v3593_v61 }
  0xca   : > { %1407 = vmatmul.mubr.bf16.gmra.mxu0 %v3599_v62 }
  0xcb   : > { %1570 = vmatmul.mubr.bf16.gmra.mxu1 %v3601_v1  ;;  %1416 = vmatprep.mubr.bf16.mxu0 %v3603_v2 }
  0xcc   : > { %1579 = vmatprep.mubr.bf16.mxu1 %v3605_v3 }
  0xd2   : > { %1417 = vmatmul.mubr.bf16.gmra.mxu0 %v3034_v10 }
  0xd3   : > { %1580 = vmatmul.mubr.bf16.gmra.mxu1 %v3035_v11  ;;  %1426 = vmatprep.mubr.bf16.mxu0 %v3042_v12 }
  0xd4   : > { %1589 = vmatprep.mubr.bf16.mxu1 %v3044_v13 }
  0xda   : > { %1427 = vmatmul.mubr.bf16.gmra.mxu0 %v3046_v14 }
  0xdb   : > { %1590 = vmatmul.mubr.bf16.gmra.mxu1 %v3047_v16  ;;  %1436 = vmatprep.mubr.bf16.mxu0 %v3054_v19 }
  0xdc   : > { %1599 = vmatprep.mubr.bf16.mxu1 %v3056_v22 }
  0xe2   : > { %1437 = vmatmul.mubr.bf16.gmra.mxu0 %v3611_v26 }
  0xe3   : > { %1600 = vmatmul.mubr.bf16.gmra.mxu1 %v3613_v27  ;;  %1642 = vmatprep.mubr.bf16.mxu0 %v3406_v49 }
  0xe4   : > { %1805 = vmatprep.mubr.bf16.mxu1 %v3409_v51 }
  0xea   : > { %1643 = vmatmul.mubr.bf16.vlgmr.msra.gmra.mxu0 %v3429_v4 }
  0xeb   : > { %1806 = vmatmul.mubr.bf16.vlgmr.msra.gmra.mxu1 %v3431_v5  ;;  %1652 = vmatprep.mubr.bf16.mxu0 %v3435_v8 }
  0xec   : > { %1815 = vmatprep.mubr.bf16.mxu1 %v3437_v9 }
  0xf2   : > { %1653 = vmatmul.mubr.bf16.gmra.mxu0 %v3448_v15 }
  0xf3   : > { %1816 = vmatmul.mubr.bf16.gmra.mxu1 %v3451_v17  ;;  %1662 = vmatprep.mubr.bf16.mxu0 %v3455_v20 }
  0xf4   : > { %1825 = vmatprep.mubr.bf16.mxu1 %v3457_v21 }
  0xfa   : > { %1663 = vmatmul.mubr.bf16.gmra.mxu0 %v3469_v28 }
  0xfb   : > { %1826 = vmatmul.mubr.bf16.gmra.mxu1 %v3471_v29  ;;  %1672 = vmatprep.mubr.bf16.mxu0 %v3473_v30 }
  0xfc   : > { %1835 = vmatprep.mubr.bf16.mxu1 %v3475_v31 }
 0x102   : > { %1673 = vmatmul.mubr.bf16.gmra.mxu0 %v3487_v38 }
 0x103   : > { %1836 = vmatmul.mubr.bf16.gmra.mxu1 %v3491_v41  ;;  %1682 = vmatprep.mubr.bf16.mxu0 %v3493_v42 }
 0x104   : > { %1845 = vmatprep.mubr.bf16.mxu1 %v3495_v43 }
 0x10a   : > { %1683 = vmatmul.mubr.bf16.gmra.mxu0 %v3506_v50 }
 0x10b   : > { %1846 = vmatmul.mubr.bf16.gmra.mxu1 %v3508_v52  ;;  %1692 = vmatprep.mubr.bf16.mxu0 %v3513_v56 }
 0x10c   : > { %1855 = vmatprep.mubr.bf16.mxu1 %v3515_v57 }
 0x112   : > { %1693 = vmatmul.mubr.bf16.gmra.mxu0 %v3526_v63 }
 0x113   : > { %1856 = vmatmul.mubr.bf16.gmra.mxu1 %v3528_v0  ;;  %1702 = vmatprep.mubr.bf16.mxu0 %v3533_v6 }
 0x114   : > { %1865 = vmatprep.mubr.bf16.mxu1 %v3535_v7 }
 0x11a   : > { %1703 = vmatmul.mubr.bf16.gmra.mxu0 %v3547_v18 }
 0x11b   : > { %1866 = vmatmul.mubr.bf16.gmra.mxu1 %v3551_v23  ;;  %1712 = vmatprep.mubr.bf16.mxu0 %v3553_v24 }
 0x11c   : > { %1875 = vmatprep.mubr.bf16.mxu1 %v3555_v25 }
 0x122   : > { %1713 = vmatmul.mubr.bf16.gmra.mxu0 %v3569_v39 }
 0x123   : > { %1876 = vmatmul.mubr.bf16.gmra.mxu1 %v3571_v40  ;;  %1722 = vmatprep.mubr.bf16.mxu0 %v3573_v44 }
 0x124   : > { %1885 = vmatprep.mubr.bf16.mxu1 %v3575_v45 }
 0x12a   : > { %1723 = vmatmul.mubr.bf16.gmra.mxu0 %v3587_v58 }
 0x12b   : > { %1886 = vmatmul.mubr.bf16.gmra.mxu1 %v3589_v59  ;;  %1732 = vmatprep.mubr.bf16.mxu0 %v3591_v60 }
 0x12c   : > { %1895 = vmatprep.mubr.bf16.mxu1 %v3593_v61 }
 0x132   : > { %1733 = vmatmul.mubr.bf16.gmra.mxu0 %v3599_v62 }
 0x133   : > { %1896 = vmatmul.mubr.bf16.gmra.mxu1 %v3601_v1  ;;  %1742 = vmatprep.mubr.bf16.mxu0 %v3603_v2 }
 0x134   : > { %1905 = vmatprep.mubr.bf16.mxu1 %v3605_v3 }
 0x13a   : > { %1743 = vmatmul.mubr.bf16.gmra.mxu0 %v3034_v10 }
 0x13b   : > { %1906 = vmatmul.mubr.bf16.gmra.mxu1 %v3035_v11  ;;  %1752 = vmatprep.mubr.bf16.mxu0 %v3042_v12 }
 0x13c   : > { %1915 = vmatprep.mubr.bf16.mxu1 %v3044_v13 }
 0x142   : > { %v1318_v49 = vpop.f32.mrf.mxu0  ;;  %1753 = vmatmul.mubr.bf16.gmra.mxu0 %v3046_v14 }
 0x143   : > { %v1481_v51 = vpop.f32.mrf.mxu1  ;;  %1916 = vmatmul.mubr.bf16.gmra.mxu1 %v3047_v16  ;;  %1762 = vmatprep.mubr.bf16.mxu0 %v3054_v19 }
 0x144   : > { %1925 = vmatprep.mubr.bf16.mxu1 %v3056_v22  ;;  %v1320_v4 = vpop.f32.mrf.mxu0  ;;  %v1482_v8 = vadd.f32 %v1481_v51, %v1318_v49 }
 0x145   : > { %v1483_v5 = vpop.f32.mrf.mxu1 }
 0x146   : > { %v1484_v9 = vadd.f32 %v1483_v5, %v1320_v4  ;;  %v1322_v15 = vpop.f32.mrf.mxu0 }
 0x147   : > { %v1485_v17 = vpop.f32.mrf.mxu1 }
 0x148   : > { %v2663_v20 = vpack.c.bf16 %v1484_v9, %v1482_v8  ;;  %v1324_v21 = vpop.f32.mrf.mxu0  ;;  %v1486_v29 = vadd.f32 %v1485_v17, %v1322_v15 }
 0x149   : > { %v1487_v28 = vpop.f32.mrf.mxu1 }
 0x14a   : > { %2248 = vst [vmem:[%s3660_s19] sm:$0xff] %v2663_v20  ;;  %v1488_v30 = vadd.f32 %v1487_v28, %v1324_v21  ;;  %v1328_v31 = vpop.f32.mrf.mxu0  ;;  %1763 = vmatmul.mubr.bf16.gmra.mxu0 %v3611_v26 }
 0x14b   : > { %v1491_v38 = vpop.f32.mrf.mxu1  ;;  %1926 = vmatmul.mubr.bf16.gmra.mxu1 %v3613_v27 }
 0x14c   : > { %v2665_v41 = vpack.c.bf16 %v1488_v30, %v1486_v29  ;;  %v1330_v42 = vpop.f32.mrf.mxu0  ;;  %v1492_v50 = vadd.f32 %v1491_v38, %v1328_v31 }
 0x14d   : > { %v1493_v43 = vpop.f32.mrf.mxu1 }
 0x14e   : > { %2250 = vst [vmem:[%s3660_s19 + $0x10] sm:$0xff] %v2665_v41  ;;  %v1494_v52 = vadd.f32 %v1493_v43, %v1330_v42  ;;  %v1332_v56 = vpop.f32.mrf.mxu0 }
 0x14f   : > { %v1495_v57 = vpop.f32.mrf.mxu1 }
 0x150   : > { %v2667_v63 = vpack.c.bf16 %v1494_v52, %v1492_v50  ;;  %v1334_v0 = vpop.f32.mrf.mxu0  ;;  %v1496_v7 = vadd.f32 %v1495_v57, %v1332_v56 }
 0x151   : > { %v1497_v6 = vpop.f32.mrf.mxu1 }
 0x152   : > { %2252 = vst [vmem:[%s3660_s19 + $0x20] sm:$0xff] %v2667_v63  ;;  %v1498_v18 = vadd.f32 %v1497_v6, %v1334_v0  ;;  %v1338_v23 = vpop.f32.mrf.mxu0 }
 0x153   : > { %v1501_v24 = vpop.f32.mrf.mxu1 }
 0x154   : > { %v2669_v25 = vpack.c.bf16 %v1498_v18, %v1496_v7  ;;  %v1340_v32 = vpop.f32.mrf.mxu0  ;;  %v1502_v34 = vadd.f32 %v1501_v24, %v1338_v23 }
 0x155   : > { %v1503_v33 = vpop.f32.mrf.mxu1 }
 0x156   : > { %2254 = vst [vmem:[%s3660_s19 + $0x30] sm:$0xff] %v2669_v25  ;;  %v1504_v35 = vadd.f32 %v1503_v33, %v1340_v32  ;;  %v1342_v36 = vpop.f32.mrf.mxu0 }
 0x157   : > { %v1505_v37 = vpop.f32.mrf.mxu1 }
 0x158   : > { %v2671_v39 = vpack.c.bf16 %v1504_v35, %v1502_v34  ;;  %v1344_v40 = vpop.f32.mrf.mxu0  ;;  %v1506_v45 = vadd.f32 %v1505_v37, %v1342_v36 }
 0x159   : > { %v1507_v44 = vpop.f32.mrf.mxu1 }
 0x15a   : > { %2256 = vst [vmem:[%s3660_s19 + $0x40] sm:$0xff] %v2671_v39  ;;  %v1508_v46 = vadd.f32 %v1507_v44, %v1344_v40  ;;  %v1348_v47 = vpop.f32.mrf.mxu0 }
 0x15b   : > { %v1511_v48 = vpop.f32.mrf.mxu1 }
 0x15c   : > { %v2673_v53 = vpack.c.bf16 %v1508_v46, %v1506_v45  ;;  %v1350_v54 = vpop.f32.mrf.mxu0  ;;  %v1512_v58 = vadd.f32 %v1511_v48, %v1348_v47 }
 0x15d   : > { %v1513_v55 = vpop.f32.mrf.mxu1 }
 0x15e   : > { %2258 = vst [vmem:[%s3660_s19 + $0x50] sm:$0xff] %v2673_v53  ;;  %v1514_v59 = vadd.f32 %v1513_v55, %v1350_v54  ;;  %v1352_v60 = vpop.f32.mrf.mxu0 }
 0x15f   : > { %v1515_v61 = vpop.f32.mrf.mxu1 }
 0x160   : > { %v2675_v62 = vpack.c.bf16 %v1514_v59, %v1512_v58  ;;  %v1354_v1 = vpop.f32.mrf.mxu0  ;;  %v1516_v3 = vadd.f32 %v1515_v61, %v1352_v60 }
 0x161   : > { %v1517_v2 = vpop.f32.mrf.mxu1 }
 0x162   : > { %2260 = vst [vmem:[%s3660_s19 + $0x60] sm:$0xff] %v2675_v62  ;;  %v1518_v10 = vadd.f32 %v1517_v2, %v1354_v1  ;;  %v1358_v11 = vpop.f32.mrf.mxu0 }
 0x163   : > { %v1521_v12 = vpop.f32.mrf.mxu1 }
 0x164   : > { %v2677_v13 = vpack.c.bf16 %v1518_v10, %v1516_v3  ;;  %v1360_v14 = vpop.f32.mrf.mxu0  ;;  %v1522_v19 = vadd.f32 %v1521_v12, %v1358_v11 }
 0x165   : > { %v1523_v16 = vpop.f32.mrf.mxu1 }
 0x166   : > { %2262 = vst [vmem:[%s3660_s19 + $0x70] sm:$0xff] %v2677_v13  ;;  %v1524_v22 = vadd.f32 %v1523_v16, %v1360_v14  ;;  %v1362_v26 = vpop.f32.mrf.mxu0 }
 0x167   : > { %v1525_v27 = vpop.f32.mrf.mxu1 }
 0x168   : > { %v2679_v49 = vpack.c.bf16 %v1524_v22, %v1522_v19  ;;  %v1364_v51 = vpop.f32.mrf.mxu0  ;;  %v1526_v5 = vadd.f32 %v1525_v27, %v1362_v26 }
 0x169   : > { %v1527_v4 = vpop.f32.mrf.mxu1 }
 0x16a   : > { %2264 = vst [vmem:[%s3660_s19 + $0x80] sm:$0xff] %v2679_v49  ;;  %v1528_v8 = vadd.f32 %v1527_v4, %v1364_v51  ;;  %v1368_v9 = vpop.f32.mrf.mxu0 }
 0x16b   : > { %v1531_v15 = vpop.f32.mrf.mxu1 }
 0x16c   : > { %v2681_v17 = vpack.c.bf16 %v1528_v8, %v1526_v5  ;;  %v1370_v20 = vpop.f32.mrf.mxu0  ;;  %v1532_v28 = vadd.f32 %v1531_v15, %v1368_v9 }
 0x16d   : > { %v1533_v21 = vpop.f32.mrf.mxu1 }
 0x16e   : > { %2266 = vst [vmem:[%s3660_s19 + $0x90] sm:$0xff] %v2681_v17  ;;  %v1534_v29 = vadd.f32 %v1533_v21, %v1370_v20  ;;  %v1372_v30 = vpop.f32.mrf.mxu0 }
 0x16f   : > { %v1535_v31 = vpop.f32.mrf.mxu1 }
 0x170   : > { %v2683_v38 = vpack.c.bf16 %v1534_v29, %v1532_v28  ;;  %v1374_v41 = vpop.f32.mrf.mxu0  ;;  %v1536_v43 = vadd.f32 %v1535_v31, %v1372_v30 }
 0x171   : > { %v1537_v42 = vpop.f32.mrf.mxu1 }
 0x172   : > { %2268 = vst [vmem:[%s3660_s19 + $0xa0] sm:$0xff] %v2683_v38  ;;  %v1538_v50 = vadd.f32 %v1537_v42, %v1374_v41  ;;  %v1378_v52 = vpop.f32.mrf.mxu0 }
 0x173   : > { %v1541_v56 = vpop.f32.mrf.mxu1 }
 0x174   : > { %v2685_v57 = vpack.c.bf16 %v1538_v50, %v1536_v43  ;;  %v1380_v63 = vpop.f32.mrf.mxu0  ;;  %v1542_v6 = vadd.f32 %v1541_v56, %v1378_v52 }
 0x175   : > { %v1543_v0 = vpop.f32.mrf.mxu1 }
 0x176   : > { %2270 = vst [vmem:[%s3660_s19 + $0xb0] sm:$0xff] %v2685_v57  ;;  %v1544_v7 = vadd.f32 %v1543_v0, %v1380_v63  ;;  %v1382_v18 = vpop.f32.mrf.mxu0 }
 0x177   : > { %v1545_v23 = vpop.f32.mrf.mxu1 }
 0x178   : > { %v2687_v24 = vpack.c.bf16 %v1544_v7, %v1542_v6  ;;  %v1384_v25 = vpop.f32.mrf.mxu0  ;;  %v1546_v33 = vadd.f32 %v1545_v23, %v1382_v18 }
 0x179   : > { %v1547_v32 = vpop.f32.mrf.mxu1 }
 0x17a   : > { %2272 = vst [vmem:[%s3660_s19 + $0xc0] sm:$0xff] %v2687_v24  ;;  %v1548_v34 = vadd.f32 %v1547_v32, %v1384_v25  ;;  %v1388_v35 = vpop.f32.mrf.mxu0 }
 0x17b   : > { %v1551_v36 = vpop.f32.mrf.mxu1 }
 0x17c   : > { %v2689_v37 = vpack.c.bf16 %v1548_v34, %v1546_v33  ;;  %v1390_v39 = vpop.f32.mrf.mxu0  ;;  %v1552_v44 = vadd.f32 %v1551_v36, %v1388_v35 }
 0x17d   : > { %v1553_v40 = vpop.f32.mrf.mxu1 }
 0x17e   : > { %2274 = vst [vmem:[%s3660_s19 + $0xd0] sm:$0xff] %v2689_v37  ;;  %v1554_v45 = vadd.f32 %v1553_v40, %v1390_v39  ;;  %v1392_v46 = vpop.f32.mrf.mxu0 }
 0x17f   : > { %v1555_v47 = vpop.f32.mrf.mxu1 }
 0x180   : > { %v2691_v48 = vpack.c.bf16 %v1554_v45, %v1552_v44  ;;  %v1394_v53 = vpop.f32.mrf.mxu0  ;;  %v1556_v55 = vadd.f32 %v1555_v47, %v1392_v46 }
 0x181   : > { %v1557_v54 = vpop.f32.mrf.mxu1 }
 0x182   : > { %2276 = vst [vmem:[%s3660_s19 + $0xe0] sm:$0xff] %v2691_v48  ;;  %v1558_v58 = vadd.f32 %v1557_v54, %v1394_v53  ;;  %v1398_v59 = vpop.f32.mrf.mxu0 }
 0x183   : > { %v1561_v60 = vpop.f32.mrf.mxu1 }
 0x184   : > { %v2693_v61 = vpack.c.bf16 %v1558_v58, %v1556_v55  ;;  %v1400_v62 = vpop.f32.mrf.mxu0  ;;  %v1562_v2 = vadd.f32 %v1561_v60, %v1398_v59 }
 0x185   : > { %v1563_v1 = vpop.f32.mrf.mxu1 }
 0x186   : > { %2278 = vst [vmem:[%s3660_s19 + $0xf0] sm:$0xff] %v2693_v61  ;;  %v1564_v3 = vadd.f32 %v1563_v1, %v1400_v62  ;;  %v1402_v10 = vpop.f32.mrf.mxu0 }
 0x187   : > { %v1565_v11 = vpop.f32.mrf.mxu1 }
 0x188   : > { %v2695_v12 = vpack.c.bf16 %v1564_v3, %v1562_v2  ;;  %v1404_v13 = vpop.f32.mrf.mxu0  ;;  %v1566_v16 = vadd.f32 %v1565_v11, %v1402_v10 }
 0x189   : > { %v1567_v14 = vpop.f32.mrf.mxu1 }
 0x18a   : > { %2280 = vst [vmem:[%s3660_s19 + $0x100] sm:$0xff] %v2695_v12  ;;  %v1568_v19 = vadd.f32 %v1567_v14, %v1404_v13  ;;  %v1408_v22 = vpop.f32.mrf.mxu0 }
 0x18b   : > { %v1571_v26 = vpop.f32.mrf.mxu1 }
 0x18c   : > { %v2697_v27 = vpack.c.bf16 %v1568_v19, %v1566_v16  ;;  %v1410_v49 = vpop.f32.mrf.mxu0  ;;  %v1572_v4 = vadd.f32 %v1571_v26, %v1408_v22 }
 0x18d   : > { %v1573_v51 = vpop.f32.mrf.mxu1 }
 0x18e   : > { %2282 = vst [vmem:[%s3660_s19 + $0x110] sm:$0xff] %v2697_v27  ;;  %v1574_v5 = vadd.f32 %v1573_v51, %v1410_v49  ;;  %v1412_v8 = vpop.f32.mrf.mxu0 }
 0x18f   : > { %v1575_v9 = vpop.f32.mrf.mxu1 }
 0x190   : > { %v2699_v15 = vpack.c.bf16 %v1574_v5, %v1572_v4  ;;  %v1414_v17 = vpop.f32.mrf.mxu0  ;;  %v1576_v21 = vadd.f32 %v1575_v9, %v1412_v8 }
 0x191   : > { %v1577_v20 = vpop.f32.mrf.mxu1 }
 0x192   : > { %2284 = vst [vmem:[%s3660_s19 + $0x120] sm:$0xff] %v2699_v15  ;;  %v1578_v28 = vadd.f32 %v1577_v20, %v1414_v17  ;;  %v1418_v29 = vpop.f32.mrf.mxu0 }
 0x193   : > { %v1581_v30 = vpop.f32.mrf.mxu1 }
 0x194   : > { %v2701_v31 = vpack.c.bf16 %v1578_v28, %v1576_v21  ;;  %v1420_v38 = vpop.f32.mrf.mxu0  ;;  %v1582_v42 = vadd.f32 %v1581_v30, %v1418_v29 }
 0x195   : > { %v1583_v41 = vpop.f32.mrf.mxu1 }
 0x196   : > { %2286 = vst [vmem:[%s3660_s19 + $0x130] sm:$0xff] %v2701_v31  ;;  %v1584_v43 = vadd.f32 %v1583_v41, %v1420_v38  ;;  %v1422_v50 = vpop.f32.mrf.mxu0 }
 0x197   : > { %v1585_v52 = vpop.f32.mrf.mxu1 }
 0x198   : > { %v2703_v56 = vpack.c.bf16 %v1584_v43, %v1582_v42  ;;  %v1424_v57 = vpop.f32.mrf.mxu0  ;;  %v1586_v0 = vadd.f32 %v1585_v52, %v1422_v50 }
 0x199   : > { %v1587_v63 = vpop.f32.mrf.mxu1 }
 0x19a   : > { %2288 = vst [vmem:[%s3660_s19 + $0x140] sm:$0xff] %v2703_v56  ;;  %v1588_v6 = vadd.f32 %v1587_v63, %v1424_v57  ;;  %v1428_v7 = vpop.f32.mrf.mxu0 }
 0x19b   : > { %v1591_v18 = vpop.f32.mrf.mxu1 }
 0x19c   : > { %v2705_v23 = vpack.c.bf16 %v1588_v6, %v1586_v0  ;;  %v1430_v24 = vpop.f32.mrf.mxu0  ;;  %v1592_v32 = vadd.f32 %v1591_v18, %v1428_v7 }
 0x19d   : > { %v1593_v25 = vpop.f32.mrf.mxu1 }
 0x19e   : > { %2290 = vst [vmem:[%s3660_s19 + $0x150] sm:$0xff] %v2705_v23  ;;  %v1594_v33 = vadd.f32 %v1593_v25, %v1430_v24  ;;  %v1432_v34 = vpop.f32.mrf.mxu0 }
 0x19f   : > { %v1595_v35 = vpop.f32.mrf.mxu1 }
 0x1a0   : > { %v2707_v36 = vpack.c.bf16 %v1594_v33, %v1592_v32  ;;  %v1434_v37 = vpop.f32.mrf.mxu0  ;;  %v1596_v40 = vadd.f32 %v1595_v35, %v1432_v34 }
 0x1a1   : > { %v1597_v39 = vpop.f32.mrf.mxu1 }
 0x1a2   : > { %2292 = vst [vmem:[%s3660_s19 + $0x160] sm:$0xff] %v2707_v36  ;;  %v1598_v44 = vadd.f32 %v1597_v39, %v1434_v37  ;;  %v1438_v45 = vpop.f32.mrf.mxu0 }
 0x1a3   : > { %v1601_v46 = vpop.f32.mrf.mxu1 }
 0x1a4   : > { %v2709_v47 = vpack.c.bf16 %v1598_v44, %v1596_v40  ;;  %v1440_v48 = vpop.f32.mrf.mxu0  ;;  %v1602_v54 = vadd.f32 %v1601_v46, %v1438_v45 }
 0x1a5   : > { %v1603_v53 = vpop.f32.mrf.mxu1 }
 0x1a6   : > { %2294 = vst [vmem:[%s3660_s19 + $0x170] sm:$0xff] %v2709_v47  ;;  %v1604_v55 = vadd.f32 %v1603_v53, %v1440_v48  ;;  %v1442_v58 = vpop.f32.mrf.mxu0 }
 0x1a7   : > { %v1605_v59 = vpop.f32.mrf.mxu1 }
 0x1a8   : > { %v2711_v60 = vpack.c.bf16 %v1604_v55, %v1602_v54  ;;  %v1444_v61 = vpop.f32.mrf.mxu0  ;;  %v1606_v1 = vadd.f32 %v1605_v59, %v1442_v58 }
 0x1a9   : > { %v1607_v62 = vpop.f32.mrf.mxu1 }
 0x1aa   : > { %2296 = vst [vmem:[%s3660_s19 + $0x180] sm:$0xff] %v2711_v60  ;;  %v1608_v2 = vadd.f32 %v1607_v62, %v1444_v61  ;;  %v1644_v3 = vpop.f32.mrf.mxu0 }
 0x1ab   : > { %v1807_v10 = vpop.f32.mrf.mxu1 }
 0x1ac   : > { %v2713_v11 = vpack.c.bf16 %v1608_v2, %v1606_v1  ;;  %v1646_v12 = vpop.f32.mrf.mxu0  ;;  %v1808_v14 = vadd.f32 %v1807_v10, %v1644_v3 }
 0x1ad   : > { %v1809_v13 = vpop.f32.mrf.mxu1 }
 0x1ae   : > { %2298 = vst [vmem:[%s3660_s19 + $0x190] sm:$0xff] %v2713_v11  ;;  %v1810_v16 = vadd.f32 %v1809_v13, %v1646_v12  ;;  %v1648_v19 = vpop.f32.mrf.mxu0 }
 0x1af   : > { %v1811_v22 = vpop.f32.mrf.mxu1 }
 0x1b0   : > { %v2664_v26 = vpack.c.bf16 %v1810_v16, %v1808_v14  ;;  %v1650_v27 = vpop.f32.mrf.mxu0  ;;  %v1812_v51 = vadd.f32 %v1811_v22, %v1648_v19 }
 0x1b1   : > { %v1813_v49 = vpop.f32.mrf.mxu1 }
 0x1b2   : > { %2249 = vst [vmem:[%s3660_s19 + $0x8] sm:$0xff] %v2664_v26  ;;  %v1814_v4 = vadd.f32 %v1813_v49, %v1650_v27  ;;  %v1654_v5 = vpop.f32.mrf.mxu0 }
 0x1b3   : > { %v1817_v8 = vpop.f32.mrf.mxu1 }
 0x1b4   : > { %v2666_v9 = vpack.c.bf16 %v1814_v4, %v1812_v51  ;;  %v1656_v15 = vpop.f32.mrf.mxu0  ;;  %v1818_v20 = vadd.f32 %v1817_v8, %v1654_v5 }
 0x1b5   : > { %v1819_v17 = vpop.f32.mrf.mxu1 }
 0x1b6   : > { %2251 = vst [vmem:[%s3660_s19 + $0x18] sm:$0xff] %v2666_v9  ;;  %v1820_v21 = vadd.f32 %v1819_v17, %v1656_v15  ;;  %v1658_v28 = vpop.f32.mrf.mxu0 }
 0x1b7   : > { %v1821_v29 = vpop.f32.mrf.mxu1 }
 0x1b8   : > { %v2668_v30 = vpack.c.bf16 %v1820_v21, %v1818_v20  ;;  %v1660_v31 = vpop.f32.mrf.mxu0  ;;  %v1822_v41 = vadd.f32 %v1821_v29, %v1658_v28 }
 0x1b9   : > { %v1823_v38 = vpop.f32.mrf.mxu1 }
 0x1ba   : > { %2253 = vst [vmem:[%s3660_s19 + $0x28] sm:$0xff] %v2668_v30  ;;  %v1824_v42 = vadd.f32 %v1823_v38, %v1660_v31  ;;  %v1664_v43 = vpop.f32.mrf.mxu0 }
 0x1bb   : > { %v1827_v50 = vpop.f32.mrf.mxu1 }
 0x1bc   : > { %v2670_v52 = vpack.c.bf16 %v1824_v42, %v1822_v41  ;;  %v1666_v56 = vpop.f32.mrf.mxu0  ;;  %v1828_v63 = vadd.f32 %v1827_v50, %v1664_v43 }
 0x1bd   : > { %v1829_v57 = vpop.f32.mrf.mxu1 }
 0x1be   : > { %2255 = vst [vmem:[%s3660_s19 + $0x38] sm:$0xff] %v2670_v52  ;;  %v1830_v0 = vadd.f32 %v1829_v57, %v1666_v56  ;;  %v1668_v6 = vpop.f32.mrf.mxu0 }
 0x1bf   : > { %v1831_v7 = vpop.f32.mrf.mxu1 }
 0x1c0   : > { %v2672_v18 = vpack.c.bf16 %v1830_v0, %v1828_v63  ;;  %v1670_v23 = vpop.f32.mrf.mxu0  ;;  %v1832_v25 = vadd.f32 %v1831_v7, %v1668_v6 }
 0x1c1   : > { %v1833_v24 = vpop.f32.mrf.mxu1 }
 0x1c2   : > { %2257 = vst [vmem:[%s3660_s19 + $0x48] sm:$0xff] %v2672_v18  ;;  %v1834_v32 = vadd.f32 %v1833_v24, %v1670_v23  ;;  %v1674_v33 = vpop.f32.mrf.mxu0 }
 0x1c3   : > { %v1837_v34 = vpop.f32.mrf.mxu1 }
 0x1c4   : > { %v2674_v35 = vpack.c.bf16 %v1834_v32, %v1832_v25  ;;  %v1676_v36 = vpop.f32.mrf.mxu0  ;;  %v1838_v39 = vadd.f32 %v1837_v34, %v1674_v33 }
 0x1c5   : > { %v1839_v37 = vpop.f32.mrf.mxu1 }
 0x1c6   : > { %2259 = vst [vmem:[%s3660_s19 + $0x58] sm:$0xff] %v2674_v35  ;;  %v1840_v40 = vadd.f32 %v1839_v37, %v1676_v36  ;;  %v1678_v44 = vpop.f32.mrf.mxu0 }
 0x1c7   : > { %v1841_v45 = vpop.f32.mrf.mxu1 }
 0x1c8   : > { %v2676_v46 = vpack.c.bf16 %v1840_v40, %v1838_v39  ;;  %v1680_v47 = vpop.f32.mrf.mxu0  ;;  %v1842_v53 = vadd.f32 %v1841_v45, %v1678_v44 }
 0x1c9   : > { %v1843_v48 = vpop.f32.mrf.mxu1 }
 0x1ca   : > { %2261 = vst [vmem:[%s3660_s19 + $0x68] sm:$0xff] %v2676_v46  ;;  %v1844_v54 = vadd.f32 %v1843_v48, %v1680_v47  ;;  %v1684_v55 = vpop.f32.mrf.mxu0 }
 0x1cb   : > { %v1847_v58 = vpop.f32.mrf.mxu1 }
 0x1cc   : > { %v2678_v59 = vpack.c.bf16 %v1844_v54, %v1842_v53  ;;  %v1686_v60 = vpop.f32.mrf.mxu0  ;;  %v1848_v62 = vadd.f32 %v1847_v58, %v1684_v55 }
 0x1cd   : > { %v1849_v61 = vpop.f32.mrf.mxu1 }
 0x1ce   : > { %2263 = vst [vmem:[%s3660_s19 + $0x78] sm:$0xff] %v2678_v59  ;;  %v1850_v1 = vadd.f32 %v1849_v61, %v1686_v60  ;;  %v1688_v2 = vpop.f32.mrf.mxu0 }
 0x1cf   : > { %v1851_v3 = vpop.f32.mrf.mxu1 }
 0x1d0   : > { %v2680_v10 = vpack.c.bf16 %v1850_v1, %v1848_v62  ;;  %v1690_v11 = vpop.f32.mrf.mxu0  ;;  %v1852_v13 = vadd.f32 %v1851_v3, %v1688_v2 }
 0x1d1   : > { %v1853_v12 = vpop.f32.mrf.mxu1 }
 0x1d2   : > { %2265 = vst [vmem:[%s3660_s19 + $0x88] sm:$0xff] %v2680_v10  ;;  %v1854_v14 = vadd.f32 %v1853_v12, %v1690_v11  ;;  %v1694_v16 = vpop.f32.mrf.mxu0 }
 0x1d3   : > { %v1857_v19 = vpop.f32.mrf.mxu1 }
 0x1d4   : > { %v2682_v22 = vpack.c.bf16 %v1854_v14, %v1852_v13  ;;  %v1696_v26 = vpop.f32.mrf.mxu0  ;;  %v1858_v49 = vadd.f32 %v1857_v19, %v1694_v16 }
 0x1d5   : > { %v1859_v27 = vpop.f32.mrf.mxu1 }
 0x1d6   : > { %2267 = vst [vmem:[%s3660_s19 + $0x98] sm:$0xff] %v2682_v22  ;;  %v1860_v51 = vadd.f32 %v1859_v27, %v1696_v26  ;;  %v1698_v4 = vpop.f32.mrf.mxu0 }
 0x1d7   : > { %v1861_v5 = vpop.f32.mrf.mxu1 }
 0x1d8   : > { %v2684_v8 = vpack.c.bf16 %v1860_v51, %v1858_v49  ;;  %v1700_v9 = vpop.f32.mrf.mxu0  ;;  %v1862_v17 = vadd.f32 %v1861_v5, %v1698_v4 }
 0x1d9   : > { %v1863_v15 = vpop.f32.mrf.mxu1 }
 0x1da   : > { %2269 = vst [vmem:[%s3660_s19 + $0xa8] sm:$0xff] %v2684_v8  ;;  %v1864_v20 = vadd.f32 %v1863_v15, %v1700_v9  ;;  %v1704_v21 = vpop.f32.mrf.mxu0 }
 0x1db   : > { %v1867_v28 = vpop.f32.mrf.mxu1 }
 0x1dc   : > { %v2686_v29 = vpack.c.bf16 %v1864_v20, %v1862_v17  ;;  %v1706_v30 = vpop.f32.mrf.mxu0  ;;  %v1868_v38 = vadd.f32 %v1867_v28, %v1704_v21 }
 0x1dd   : > { %v1869_v31 = vpop.f32.mrf.mxu1 }
 0x1de   : > { %2271 = vst [vmem:[%s3660_s19 + $0xb8] sm:$0xff] %v2686_v29  ;;  %v1870_v41 = vadd.f32 %v1869_v31, %v1706_v30  ;;  %v1708_v42 = vpop.f32.mrf.mxu0 }
 0x1df   : > { %v1871_v43 = vpop.f32.mrf.mxu1 }
 0x1e0   : > { %v2688_v50 = vpack.c.bf16 %v1870_v41, %v1868_v38  ;;  %v1710_v52 = vpop.f32.mrf.mxu0  ;;  %v1872_v57 = vadd.f32 %v1871_v43, %v1708_v42 }
 0x1e1   : > { %v1873_v56 = vpop.f32.mrf.mxu1 }
 0x1e2   : > { %2273 = vst [vmem:[%s3660_s19 + $0xc8] sm:$0xff] %v2688_v50  ;;  %v1874_v63 = vadd.f32 %v1873_v56, %v1710_v52  ;;  %v1714_v0 = vpop.f32.mrf.mxu0 }
 0x1e3   : > { %v1877_v6 = vpop.f32.mrf.mxu1 }
 0x1e4   : > { %v2690_v7 = vpack.c.bf16 %v1874_v63, %v1872_v57  ;;  %v1716_v18 = vpop.f32.mrf.mxu0  ;;  %v1878_v24 = vadd.f32 %v1877_v6, %v1714_v0 }
 0x1e5   : > { %v1879_v23 = vpop.f32.mrf.mxu1 }
 0x1e6   : > { %2275 = vst [vmem:[%s3660_s19 + $0xd8] sm:$0xff] %v2690_v7  ;;  %v1880_v25 = vadd.f32 %v1879_v23, %v1716_v18  ;;  %v1718_v32 = vpop.f32.mrf.mxu0 }
 0x1e7   : > { %v1881_v33 = vpop.f32.mrf.mxu1 }
 0x1e8   : > { %v2692_v34 = vpack.c.bf16 %v1880_v25, %v1878_v24  ;;  %v1720_v35 = vpop.f32.mrf.mxu0  ;;  %v1882_v37 = vadd.f32 %v1881_v33, %v1718_v32 }
 0x1e9   : > { %v1883_v36 = vpop.f32.mrf.mxu1 }
 0x1ea   : > { %2277 = vst [vmem:[%s3660_s19 + $0xe8] sm:$0xff] %v2692_v34  ;;  %v1884_v39 = vadd.f32 %v1883_v36, %v1720_v35  ;;  %v1724_v40 = vpop.f32.mrf.mxu0 }
 0x1eb   : > { %v1887_v44 = vpop.f32.mrf.mxu1 }
 0x1ec   : > { %v2694_v45 = vpack.c.bf16 %v1884_v39, %v1882_v37  ;;  %v1726_v46 = vpop.f32.mrf.mxu0  ;;  %v1888_v48 = vadd.f32 %v1887_v44, %v1724_v40 }
 0x1ed   : > { %v1889_v47 = vpop.f32.mrf.mxu1 }
 0x1ee   : > { %2279 = vst [vmem:[%s3660_s19 + $0xf8] sm:$0xff] %v2694_v45  ;;  %v1890_v53 = vadd.f32 %v1889_v47, %v1726_v46  ;;  %v1728_v54 = vpop.f32.mrf.mxu0 }
 0x1ef   : > { %v1891_v55 = vpop.f32.mrf.mxu1 }
 0x1f0   : > { %v2696_v58 = vpack.c.bf16 %v1890_v53, %v1888_v48  ;;  %v1730_v59 = vpop.f32.mrf.mxu0  ;;  %v1892_v61 = vadd.f32 %v1891_v55, %v1728_v54 }
 0x1f1   : > { %v1893_v60 = vpop.f32.mrf.mxu1 }
 0x1f2   : > { %2281 = vst [vmem:[%s3660_s19 + $0x108] sm:$0xff] %v2696_v58  ;;  %v1894_v62 = vadd.f32 %v1893_v60, %v1730_v59  ;;  %v1734_v1 = vpop.f32.mrf.mxu0 }
 0x1f3   : > { %v1897_v2 = vpop.f32.mrf.mxu1 }
 0x1f4   : > { %v2698_v3 = vpack.c.bf16 %v1894_v62, %v1892_v61  ;;  %v1736_v10 = vpop.f32.mrf.mxu0  ;;  %v1898_v12 = vadd.f32 %v1897_v2, %v1734_v1 }
 0x1f5   : > { %v1899_v11 = vpop.f32.mrf.mxu1 }
 0x1f6   : > { %2283 = vst [vmem:[%s3660_s19 + $0x118] sm:$0xff] %v2698_v3  ;;  %v1900_v13 = vadd.f32 %v1899_v11, %v1736_v10  ;;  %v1738_v14 = vpop.f32.mrf.mxu0 }
 0x1f7   : > { %v1901_v16 = vpop.f32.mrf.mxu1 }
 0x1f8   : > { %v2700_v19 = vpack.c.bf16 %v1900_v13, %v1898_v12  ;;  %v1740_v22 = vpop.f32.mrf.mxu0  ;;  %v1902_v27 = vadd.f32 %v1901_v16, %v1738_v14 }
 0x1f9   : > { %v1903_v26 = vpop.f32.mrf.mxu1 }
 0x1fa   : > { %2285 = vst [vmem:[%s3660_s19 + $0x128] sm:$0xff] %v2700_v19  ;;  %v1904_v49 = vadd.f32 %v1903_v26, %v1740_v22  ;;  %v1744_v51 = vpop.f32.mrf.mxu0 }
 0x1fb   : > { %v1907_v4 = vpop.f32.mrf.mxu1 }
 0x1fc   : > { %v2702_v5 = vpack.c.bf16 %v1904_v49, %v1902_v27  ;;  %v1746_v8 = vpop.f32.mrf.mxu0  ;;  %v1908_v15 = vadd.f32 %v1907_v4, %v1744_v51 }
 0x1fd   : > { %v1909_v9 = vpop.f32.mrf.mxu1 }
 0x1fe   : > { %2287 = vst [vmem:[%s3660_s19 + $0x138] sm:$0xff] %v2702_v5  ;;  %v1910_v17 = vadd.f32 %v1909_v9, %v1746_v8  ;;  %v1748_v20 = vpop.f32.mrf.mxu0 }
 0x1ff   : > { %v1911_v21 = vpop.f32.mrf.mxu1 }
 0x200   : > { %v2704_v28 = vpack.c.bf16 %v1910_v17, %v1908_v15  ;;  %v1750_v29 = vpop.f32.mrf.mxu0  ;;  %v1912_v31 = vadd.f32 %v1911_v21, %v1748_v20 }
 0x201   : > { %v1913_v30 = vpop.f32.mrf.mxu1 }
 0x202   : > { %2289 = vst [vmem:[%s3660_s19 + $0x148] sm:$0xff] %v2704_v28  ;;  %v1914_v38 = vadd.f32 %v1913_v30, %v1750_v29  ;;  %v1754_v41 = vpop.f32.mrf.mxu0 }
 0x203   : > { %v1917_v42 = vpop.f32.mrf.mxu1 }
 0x204   : > { %v2706_v43 = vpack.c.bf16 %v1914_v38, %v1912_v31  ;;  %v1756_v50 = vpop.f32.mrf.mxu0  ;;  %v1918_v56 = vadd.f32 %v1917_v42, %v1754_v41 }
 0x205   : > { %v1919_v52 = vpop.f32.mrf.mxu1 }
 0x206   : > { %2291 = vst [vmem:[%s3660_s19 + $0x158] sm:$0xff] %v2706_v43  ;;  %v1920_v57 = vadd.f32 %v1919_v52, %v1756_v50  ;;  %v1758_v63 = vpop.f32.mrf.mxu0 }
 0x207   : > { %v1921_v0 = vpop.f32.mrf.mxu1 }
 0x208   : > { %v2708_v6 = vpack.c.bf16 %v1920_v57, %v1918_v56  ;;  %v1760_v7 = vpop.f32.mrf.mxu0  ;;  %v1922_v23 = vadd.f32 %v1921_v0, %v1758_v63 }
 0x209   : > { %v1923_v18 = vpop.f32.mrf.mxu1 }
 0x20a   : > { %2293 = vst [vmem:[%s3660_s19 + $0x168] sm:$0xff] %v2708_v6  ;;  %v1924_v24 = vadd.f32 %v1923_v18, %v1760_v7  ;;  %v1764_v25 = vpop.f32.mrf.mxu0 }
 0x20b   : > { %v1927_v32 = vpop.f32.mrf.mxu1 }
 0x20c   : > { %v2710_v33 = vpack.c.bf16 %v1924_v24, %v1922_v23  ;;  %v1766_v34 = vpop.f32.mrf.mxu0  ;;  %v1928_v36 = vadd.f32 %v1927_v32, %v1764_v25 }
 0x20d   : > { %v1929_v35 = vpop.f32.mrf.mxu1 }
 0x20e   : > { %2295 = vst [vmem:[%s3660_s19 + $0x178] sm:$0xff] %v2710_v33  ;;  %v1930_v37 = vadd.f32 %v1929_v35, %v1766_v34  ;;  %v1768_v39 = vpop.f32.mrf.mxu0 }
 0x20f   : > { %v1931_v40 = vpop.f32.mrf.mxu1 }
 0x210   : > { %v2712_v44 = vpack.c.bf16 %v1930_v37, %v1928_v36  ;;  %v1770_v45 = vpop.f32.mrf.mxu0  ;;  %v1932_v47 = vadd.f32 %v1931_v40, %v1768_v39 }
 0x211   : > { %v1933_v46 = vpop.f32.mrf.mxu1 }
 0x212   : > { %2297 = vst [vmem:[%s3660_s19 + $0x188] sm:$0xff] %v2712_v44  ;;  %v1934_v48 = vadd.f32 %v1933_v46, %v1770_v45 }
 0x214   : > { %v2714_v53 = vpack.c.bf16 %v1934_v48, %v1932_v47 }
 0x216   : > { %2299 = vst [vmem:[%s3660_s19 + $0x198] sm:$0xff] %v2714_v53 }
 0x217   : > { %3133 = shalt.err (!%p3130_p0)
}
 0x218   : > { %s3134_s4 = scalar_lea.hbm %s3720_s23, 6656  ;;  %s3138_s5 = scalar_lea.hbm %s3772_s2, 19968 }
 0x219   : > { %p3135_p1 = scmp.ne.s32.totalorder %s3720_s23, %s3134_s4  ;;  %p3139_p9 = scmp.lt.s32.totalorder %s3720_s23, %s3772_s2 }
 0x21a   : > { %p3140_p11 = scmp.lt.s32.totalorder %s3138_s5, %s3134_s4 }
 0x21b   : > { %p3136_p5 = pnand %p3135_p1, %p3788_p12 }
 0x21c   : > { %p3141_p2 = por %p3140_p11, %p3139_p9 }
 0x21d   : > { %p3137_p7 = pneg %p3136_p5 }
 0x21f   : > { %p3142_p3 = pnand %p3141_p2, %p3137_p7 }
 0x221   : > { %3145 = shalt.err (!%p3142_p3)
}
 0x222   : > { %s3212_s15 = smov 256   ;;  %s3213_s17 = smov 768  }
 0x223   : > { %s3214_s19 = smov 16  }
 0x224   : > { %2723 = dma.vmem_to_hbm [thread:$0]  (%p3788_p12), %s3722_s30, 6656, %s3720_s23, %s2301_s12, %s3212_s15, %s3213_s17, %s3214_s19  }
 0x225 PF: > { %s3789_s22 = sld [smem:[#allocation11_spill]]  ;;  %p2740_p13 = scmp.ge.s32.totalorder %s3204_s14, 2 }
 0x226   : > { %s2332_s16 = sand.u32 1, %s3184_s9  }
 0x227   : > { %s2333_s18 = scalar_lea.sflag [#allocation4], %s2332_s16 }
 0x22b   : > { %p3790_p4 = scmp.ne.s32.totalorder %s3789_s22, 0 }
 0x22d   : > { %p2734_p6 = pnand %p2740_p13, %p3790_p4 }
 0x22f   : > { %p2735_p8 = pneg %p2734_p6 }
 0x231   : > { %3179 = dma.done.wait (%p2735_p8), %s2333_s18, 6656  }
 0x232   : > { %3181 = vsyncadd (%p2735_p8), %s2333_s18, 4294960640  ;;  %s19_s14 = sadd.s32 1, %s3204_s14   ;;  %s3791_s9 = smov %s3188_s10 }
 0x233   : > { %p16_p10 = scmp.ge.s32.totalorder %s19_s14, 5   ;;  %s3792_s10 = smov %s3192_s11 }
 0x234   : > { %s3793_s11 = smov %s3332_s21  ;;  %s3794_s12 = smov %s3200_s13 }
 0x235   : > { %s3795_s13 = smov %s3797_s27  ;;  %18 = sbr.rel (!%p16_p10) target bundleno = 7 (0x7), region = 79 }
 0x23a   :  { %2338 = vsyncpa [#allocation3], 1 }
 0x23b   :  { %2340 = vsyncpa [#allocation3 + $0x1], 1 }
 0x23c   :  { %2341 = vsyncpa [#allocation6], 1 }
 0x23d   :  { %2343 = vsyncpa [#allocation6 + $0x1], 1 }
 0x23e   :  { %2344 = vsyncpa [#allocation4], 1 }
 0x23f   :  { %2346 = vsyncpa [#allocation4 + $0x1], 1 }

</bundles_post_ra>
